<compile_context>
chip_gen: v6e
topology: v6e:2x2x1
jax: 0.10.0
libtpu: 0.0.40
codegen_flags: <defaults>
</compile_context>

<pallas_src>
import functools

import jax
import jax.numpy as jnp
import numpy as np
from jax.experimental import pallas as pl
from jax.experimental.pallas import tpu as pltpu


def window_msa_kernel(x_ref, wqkv_ref, bqkv_ref, wproj_ref, bproj_ref, o_ref,
                      *, num_heads, windows, tokens):
    Wb, N, H = windows, tokens, num_heads
    C = x_ref.shape[-1]
    Dh = C // H

    # --- fused QKV projection over the whole window slab (MXU, bf16 x bf16 -> f32) ---
    x = x_ref[...].astype(jnp.bfloat16)                   # (Wb*N, C)
    wqkv = wqkv_ref[...].astype(jnp.bfloat16)             # (C, 3C)  (Q cols pre-scaled)
    wproj = wproj_ref[...].astype(jnp.bfloat16)           # (C, C)

    qkv2d = jnp.dot(x, wqkv, preferred_element_type=jnp.float32) + bqkv_ref[0]
    # Split only the leading (sublane-major) row axis; N is a multiple of 8,
    # so this reshape is a free relabeling (minor dim untouched).
    qkv = qkv2d.reshape(Wb, N, 3 * C).astype(jnp.bfloat16)  # (Wb, N, 3C)

    acc = jnp.zeros((Wb * N, C), dtype=jnp.float32)
    for h in range(H):  # static unroll (H is small); heads are static lane slices
        q_h = qkv[:, :, h * Dh:(h + 1) * Dh]                      # (Wb, N, Dh), scale folded in
        k_h = qkv[:, :, C + h * Dh:C + (h + 1) * Dh]              # (Wb, N, Dh)
        v_h = qkv[:, :, 2 * C + h * Dh:2 * C + (h + 1) * Dh]      # (Wb, N, Dh)

        # scores: batched over windows, contraction on the head dim
        s = jnp.einsum('bnd,bmd->bnm', q_h, k_h,
                       preferred_element_type=jnp.float32)        # (Wb, N, N) f32

        # numerically-stable softmax in f32; denominator via EUP approx reciprocal
        s = s - jnp.max(s, axis=-1, keepdims=True)
        p = jnp.exp(s)
        p = p * pl.reciprocal(jnp.sum(p, axis=-1, keepdims=True), approx=True)

        # weighted sum of values
        o_h = jnp.einsum('bnm,bmd->bnd', p.astype(jnp.bfloat16), v_h,
                         preferred_element_type=jnp.float32)      # (Wb, N, Dh) f32

        # output projection accumulated per head:
        #   out @ Wproj == sum_h out_h @ Wproj[h*Dh:(h+1)*Dh, :]
        acc = acc + jnp.dot(o_h.reshape(Wb * N, Dh).astype(jnp.bfloat16),
                            wproj[h * Dh:(h + 1) * Dh, :],
                            preferred_element_type=jnp.float32)   # (Wb*N, C)

    o_ref[...] = (acc + bproj_ref[0]).astype(o_ref.dtype)


def window_msa(x, w_qkv, b_qkv, w_proj, b_proj, num_heads, windows_per_step=None):
    """x: (B_, N, C) float32.  Returns (B_, N, C)."""
    B_, N, C = x.shape
    assert C % num_heads == 0
    head_dim = C // num_heads
    scale = head_dim ** (-0.5)

    # Fold the attention scale into the Q columns of the QKV weight AND bias
    # (static weight prep -> zero in-kernel cost; bias must be scaled too).
    w_qkv_s = jnp.concatenate([w_qkv[:, :C] * scale, w_qkv[:, C:]], axis=1)
    b_qkv_s = jnp.concatenate([b_qkv[:C] * scale, b_qkv[C:]]).reshape(1, -1)
    b_proj2 = b_proj.reshape(1, -1)

    if windows_per_step is None:
        # Keep >= 2 parallel grid steps when possible (v7x has 2 TensorCores);
        # cap the per-step slab so activations stay well within VMEM (matters
        # for real Swin widths / v7x's 64 MiB VMEM; trivial at test sizes).
        windows_per_step = max(1, B_ // 2)
        approx_bytes_per_window = (N * C * 4) * 8 + num_heads * N * N * 4
        max_wb = max(1, (8 << 20) // approx_bytes_per_window)
        windows_per_step = min(windows_per_step, max_wb)
        while B_ % windows_per_step:
            windows_per_step -= 1
    assert B_ % windows_per_step == 0
    num_steps = B_ // windows_per_step
    rows = windows_per_step * N

    # Free reshape: fold the window axis into the row (sublane) dimension so the
    # kernel sees multi-window slabs and loads/stores >= 8-sublane blocks.
    x_flat = x.reshape(B_ * N, C)

    kernel = functools.partial(window_msa_kernel, num_heads=num_heads,
                               windows=windows_per_step, tokens=N)

    out_flat = pl.pallas_call(
        kernel,
        out_shape=jax.ShapeDtypeStruct((B_ * N, C), x.dtype),
        grid_spec=pltpu.PrefetchScalarGridSpec(
            num_scalar_prefetch=0,
            grid=(num_steps,),
            in_specs=[
                pl.BlockSpec((rows, C), lambda i: (i, 0)),     # x slab (Wb windows)
                pl.BlockSpec((C, 3 * C), lambda i: (0, 0)),    # w_qkv (grid-invariant)
                pl.BlockSpec((1, 3 * C), lambda i: (0, 0)),    # b_qkv
                pl.BlockSpec((C, C), lambda i: (0, 0)),        # w_proj
                pl.BlockSpec((1, C), lambda i: (0, 0)),        # b_proj
            ],
            out_specs=pl.BlockSpec((rows, C), lambda i: (i, 0)),
        ),
        compiler_params=pltpu.CompilerParams(
            dimension_semantics=("parallel",)),
    )(x_flat, w_qkv_s, b_qkv_s, w_proj, b_proj2)

    return out_flat.reshape(B_, N, C)


def window_msa_ref(x, w_qkv, b_qkv, w_proj, b_proj, num_heads):
    """Pure-JAX f32 reference mirroring the PyTorch forward (eval mode)."""
    B_, N, C = x.shape
    Dh = C // num_heads
    scale = Dh ** (-0.5)
    qkv = x @ w_qkv + b_qkv                               # (B_, N, 3C)
    qkv = qkv.reshape(B_, N, 3, num_heads, Dh).transpose(2, 0, 3, 1, 4)
    q, k, v = qkv[0], qkv[1], qkv[2]                      # (B_, H, N, Dh)
    q = q * scale
    attn = q @ jnp.swapaxes(k, -2, -1)                    # (B_, H, N, N)
    attn = jax.nn.softmax(attn, axis=-1)
    out = (attn @ v).transpose(0, 2, 1, 3).reshape(B_, N, C)
    return out @ w_proj + b_proj


if __name__ == "__main__":
    # Small shapes: window_size=(4,4) -> N=16 tokens, dim=32, 4 heads, 8 windows.
    B_, N, C, H = 8, 16, 32, 4

    key = jax.random.PRNGKey(0)
    kx, k1, k2, k3, k4 = jax.random.split(key, 5)
    x = jax.random.normal(kx, (B_, N, C), dtype=jnp.float32)
    w_qkv = jax.random.normal(k1, (C, 3 * C), dtype=jnp.float32) * 0.05
    b_qkv = jax.random.normal(k2, (3 * C,), dtype=jnp.float32) * 0.01
    w_proj = jax.random.normal(k3, (C, C), dtype=jnp.float32) * 0.05
    b_proj = jax.random.normal(k4, (C,), dtype=jnp.float32) * 0.01

    out = window_msa(x, w_qkv, b_qkv, w_proj, b_proj, num_heads=H)
    out = jax.block_until_ready(out)

    ref = window_msa_ref(x, w_qkv, b_qkv, w_proj, b_proj, num_heads=H)
    # bf16 MXU operands with f32 accumulation -> loosen tolerance vs f32 ref.
    np.testing.assert_allclose(np.asarray(out), np.asarray(ref),
                               rtol=5e-2, atol=1e-2)

    print("KERNEL_OK")
</pallas_src>

<mosaic_0001>
module attributes {stable_mosaic.version = 11 : i64} {
  func.func @window_msa_kernel(%arg0: i32, %arg1: memref<64x32xf32, #tpu.memory_space<vmem>>, %arg2: memref<32x96xf32, #tpu.memory_space<vmem>>, %arg3: memref<1x96xf32, #tpu.memory_space<vmem>>, %arg4: memref<32x32xf32, #tpu.memory_space<vmem>>, %arg5: memref<1x32xf32, #tpu.memory_space<vmem>>, %arg6: memref<64x32xf32, #tpu.memory_space<vmem>>) attributes {dimension_semantics = [#tpu.dimension_semantics<parallel>], iteration_bounds = array<i64: 2>, scalar_prefetch = 0 : i64, scratch_operands = 0 : i64, tpu.core_type = #tpu.core_type<tc>, window_params = [{transform_indices = @transform_0, window_bounds = array<i64: 64, 32>}, {pipeline_mode = #tpu.pipeline_mode<synchronous>, transform_indices = @transform_1, window_bounds = array<i64: 32, 96>}, {pipeline_mode = #tpu.pipeline_mode<synchronous>, transform_indices = @transform_2, window_bounds = array<i64: 1, 96>}, {pipeline_mode = #tpu.pipeline_mode<synchronous>, transform_indices = @transform_3, window_bounds = array<i64: 32, 32>}, {pipeline_mode = #tpu.pipeline_mode<synchronous>, transform_indices = @transform_4, window_bounds = array<i64: 1, 32>}, {transform_indices = @transform_5, window_bounds = array<i64: 64, 32>}]} {
    %c0 = arith.constant 0 : index
    %c0_0 = arith.constant 0 : index
    %0 = vector.load %arg1[%c0, %c0_0] : memref<64x32xf32, #tpu.memory_space<vmem>>, vector<64x32xf32>
    %1 = arith.truncf %0 : vector<64x32xf32> to vector<64x32xbf16>
    %c0_1 = arith.constant 0 : index
    %c0_2 = arith.constant 0 : index
    %2 = vector.load %arg2[%c0_1, %c0_2] : memref<32x96xf32, #tpu.memory_space<vmem>>, vector<32x96xf32>
    %3 = arith.truncf %2 : vector<32x96xf32> to vector<32x96xbf16>
    %c0_3 = arith.constant 0 : index
    %c0_4 = arith.constant 0 : index
    %4 = vector.load %arg4[%c0_3, %c0_4] : memref<32x32xf32, #tpu.memory_space<vmem>>, vector<32x32xf32>
    %5 = arith.truncf %4 : vector<32x32xf32> to vector<32x32xbf16>
    %cst = arith.constant dense<0.000000e+00> : vector<64x96xf32>
    %6 = tpu.matmul %1, %3, %cst {dimension_numbers = #tpu.dot_dimension_numbers<[1], [0], [0], [1], [0, 0, 1, 1], [], []>} : vector<64x32xbf16>, vector<32x96xbf16>, vector<64x96xf32> -> vector<64x96xf32>
    %c0_5 = arith.constant 0 : index
    %c0_6 = arith.constant 0 : index
    %7 = vector.load %arg3[%c0_5, %c0_6] : memref<1x96xf32, #tpu.memory_space<vmem>>, vector<1x96xf32>
    %8 = vector.shape_cast %7 : vector<1x96xf32> to vector<96xf32>
    %9 = vector.shape_cast %8 : vector<96xf32> to vector<1x96xf32>
    %10 = vector.broadcast %9 : vector<1x96xf32> to vector<64x96xf32>
    %11 = arith.addf %6, %10 : vector<64x96xf32>
    %12 = vector.shape_cast %11 : vector<64x96xf32> to vector<4x16x96xf32>
    %13 = arith.truncf %12 : vector<4x16x96xf32> to vector<4x16x96xbf16>
    %cst_7 = arith.constant 0.000000e+00 : f32
    %14 = vector.broadcast %cst_7 : f32 to vector<64x32xf32>
    %15 = vector.extract_strided_slice %13 {offsets = [0, 0, 0], sizes = [4, 16, 8], strides = [1, 1, 1]} : vector<4x16x96xbf16> to vector<4x16x8xbf16>
    %16 = vector.extract_strided_slice %13 {offsets = [0, 0, 32], sizes = [4, 16, 8], strides = [1, 1, 1]} : vector<4x16x96xbf16> to vector<4x16x8xbf16>
    %17 = vector.extract_strided_slice %13 {offsets = [0, 0, 64], sizes = [4, 16, 8], strides = [1, 1, 1]} : vector<4x16x96xbf16> to vector<4x16x8xbf16>
    "tpu.trace_start"() <{level = 10 : i32, message = "bnd,bmd->bnm"}> : () -> ()
    %cst_8 = arith.constant dense<0.000000e+00> : vector<4x16x16xf32>
    %18 = tpu.matmul %15, %16, %cst_8 {dimension_numbers = #tpu.dot_dimension_numbers<[2], [2], [1], [1], [0, 0, 0, 1, 1, 1], [0], [0]>} : vector<4x16x8xbf16>, vector<4x16x8xbf16>, vector<4x16x16xf32> -> vector<4x16x16xf32>
    "tpu.trace_stop"() : () -> ()
    %cst_9 = arith.constant dense<0xFF800000> : vector<4x16xf32>
    %19 = vector.multi_reduction <maximumf>, %18, %cst_9 [2] : vector<4x16x16xf32> to vector<4x16xf32>
    %20 = vector.shape_cast %19 : vector<4x16xf32> to vector<4x16x1xf32>
    %21 = vector.broadcast %20 : vector<4x16x1xf32> to vector<4x16x16xf32>
    %22 = arith.subf %18, %21 : vector<4x16x16xf32>
    %23 = math.exp %22 : vector<4x16x16xf32>
    %cst_10 = arith.constant dense<0.000000e+00> : vector<4x16xf32>
    %24 = vector.multi_reduction <add>, %23, %cst_10 [2] : vector<4x16x16xf32> to vector<4x16xf32>
    %25 = vector.shape_cast %24 : vector<4x16xf32> to vector<4x16x1xf32>
    %26 = tpu.reciprocal %25 {approx = true} : vector<4x16x1xf32> -> vector<4x16x1xf32>
    %27 = vector.broadcast %26 : vector<4x16x1xf32> to vector<4x16x16xf32>
    %28 = arith.mulf %23, %27 : vector<4x16x16xf32>
    %29 = arith.truncf %28 : vector<4x16x16xf32> to vector<4x16x16xbf16>
    "tpu.trace_start"() <{level = 10 : i32, message = "bnm,bmd->bnd"}> : () -> ()
    %cst_11 = arith.constant dense<0.000000e+00> : vector<4x16x8xf32>
    %30 = tpu.matmul %29, %17, %cst_11 {dimension_numbers = #tpu.dot_dimension_numbers<[2], [1], [1], [2], [0, 0, 0, 1, 1, 2], [0], [0]>} : vector<4x16x16xbf16>, vector<4x16x8xbf16>, vector<4x16x8xf32> -> vector<4x16x8xf32>
    "tpu.trace_stop"() : () -> ()
    %31 = vector.shape_cast %30 : vector<4x16x8xf32> to vector<64x8xf32>
    %32 = arith.truncf %31 : vector<64x8xf32> to vector<64x8xbf16>
    %33 = vector.extract_strided_slice %5 {offsets = [0, 0], sizes = [8, 32], strides = [1, 1]} : vector<32x32xbf16> to vector<8x32xbf16>
    %cst_12 = arith.constant dense<0.000000e+00> : vector<64x32xf32>
    %34 = tpu.matmul %32, %33, %cst_12 {dimension_numbers = #tpu.dot_dimension_numbers<[1], [0], [0], [1], [0, 0, 1, 1], [], []>} : vector<64x8xbf16>, vector<8x32xbf16>, vector<64x32xf32> -> vector<64x32xf32>
    %35 = arith.addf %14, %34 : vector<64x32xf32>
    %36 = vector.extract_strided_slice %13 {offsets = [0, 0, 8], sizes = [4, 16, 8], strides = [1, 1, 1]} : vector<4x16x96xbf16> to vector<4x16x8xbf16>
    %37 = vector.extract_strided_slice %13 {offsets = [0, 0, 40], sizes = [4, 16, 8], strides = [1, 1, 1]} : vector<4x16x96xbf16> to vector<4x16x8xbf16>
    %38 = vector.extract_strided_slice %13 {offsets = [0, 0, 72], sizes = [4, 16, 8], strides = [1, 1, 1]} : vector<4x16x96xbf16> to vector<4x16x8xbf16>
    "tpu.trace_start"() <{level = 10 : i32, message = "bnd,bmd->bnm"}> : () -> ()
    %cst_13 = arith.constant dense<0.000000e+00> : vector<4x16x16xf32>
    %39 = tpu.matmul %36, %37, %cst_13 {dimension_numbers = #tpu.dot_dimension_numbers<[2], [2], [1], [1], [0, 0, 0, 1, 1, 1], [0], [0]>} : vector<4x16x8xbf16>, vector<4x16x8xbf16>, vector<4x16x16xf32> -> vector<4x16x16xf32>
    "tpu.trace_stop"() : () -> ()
    %cst_14 = arith.constant dense<0xFF800000> : vector<4x16xf32>
    %40 = vector.multi_reduction <maximumf>, %39, %cst_14 [2] : vector<4x16x16xf32> to vector<4x16xf32>
    %41 = vector.shape_cast %40 : vector<4x16xf32> to vector<4x16x1xf32>
    %42 = vector.broadcast %41 : vector<4x16x1xf32> to vector<4x16x16xf32>
    %43 = arith.subf %39, %42 : vector<4x16x16xf32>
    %44 = math.exp %43 : vector<4x16x16xf32>
    %cst_15 = arith.constant dense<0.000000e+00> : vector<4x16xf32>
    %45 = vector.multi_reduction <add>, %44, %cst_15 [2] : vector<4x16x16xf32> to vector<4x16xf32>
    %46 = vector.shape_cast %45 : vector<4x16xf32> to vector<4x16x1xf32>
    %47 = tpu.reciprocal %46 {approx = true} : vector<4x16x1xf32> -> vector<4x16x1xf32>
    %48 = vector.broadcast %47 : vector<4x16x1xf32> to vector<4x16x16xf32>
    %49 = arith.mulf %44, %48 : vector<4x16x16xf32>
    %50 = arith.truncf %49 : vector<4x16x16xf32> to vector<4x16x16xbf16>
    "tpu.trace_start"() <{level = 10 : i32, message = "bnm,bmd->bnd"}> : () -> ()
    %cst_16 = arith.constant dense<0.000000e+00> : vector<4x16x8xf32>
    %51 = tpu.matmul %50, %38, %cst_16 {dimension_numbers = #tpu.dot_dimension_numbers<[2], [1], [1], [2], [0, 0, 0, 1, 1, 2], [0], [0]>} : vector<4x16x16xbf16>, vector<4x16x8xbf16>, vector<4x16x8xf32> -> vector<4x16x8xf32>
    "tpu.trace_stop"() : () -> ()
    %52 = vector.shape_cast %51 : vector<4x16x8xf32> to vector<64x8xf32>
    %53 = arith.truncf %52 : vector<64x8xf32> to vector<64x8xbf16>
    %54 = vector.extract_strided_slice %5 {offsets = [8, 0], sizes = [8, 32], strides = [1, 1]} : vector<32x32xbf16> to vector<8x32xbf16>
    %cst_17 = arith.constant dense<0.000000e+00> : vector<64x32xf32>
    %55 = tpu.matmul %53, %54, %cst_17 {dimension_numbers = #tpu.dot_dimension_numbers<[1], [0], [0], [1], [0, 0, 1, 1], [], []>} : vector<64x8xbf16>, vector<8x32xbf16>, vector<64x32xf32> -> vector<64x32xf32>
    %56 = arith.addf %35, %55 : vector<64x32xf32>
    %57 = vector.extract_strided_slice %13 {offsets = [0, 0, 16], sizes = [4, 16, 8], strides = [1, 1, 1]} : vector<4x16x96xbf16> to vector<4x16x8xbf16>
    %58 = vector.extract_strided_slice %13 {offsets = [0, 0, 48], sizes = [4, 16, 8], strides = [1, 1, 1]} : vector<4x16x96xbf16> to vector<4x16x8xbf16>
    %59 = vector.extract_strided_slice %13 {offsets = [0, 0, 80], sizes = [4, 16, 8], strides = [1, 1, 1]} : vector<4x16x96xbf16> to vector<4x16x8xbf16>
    "tpu.trace_start"() <{level = 10 : i32, message = "bnd,bmd->bnm"}> : () -> ()
    %cst_18 = arith.constant dense<0.000000e+00> : vector<4x16x16xf32>
    %60 = tpu.matmul %57, %58, %cst_18 {dimension_numbers = #tpu.dot_dimension_numbers<[2], [2], [1], [1], [0, 0, 0, 1, 1, 1], [0], [0]>} : vector<4x16x8xbf16>, vector<4x16x8xbf16>, vector<4x16x16xf32> -> vector<4x16x16xf32>
    "tpu.trace_stop"() : () -> ()
    %cst_19 = arith.constant dense<0xFF800000> : vector<4x16xf32>
    %61 = vector.multi_reduction <maximumf>, %60, %cst_19 [2] : vector<4x16x16xf32> to vector<4x16xf32>
    %62 = vector.shape_cast %61 : vector<4x16xf32> to vector<4x16x1xf32>
    %63 = vector.broadcast %62 : vector<4x16x1xf32> to vector<4x16x16xf32>
    %64 = arith.subf %60, %63 : vector<4x16x16xf32>
    %65 = math.exp %64 : vector<4x16x16xf32>
    %cst_20 = arith.constant dense<0.000000e+00> : vector<4x16xf32>
    %66 = vector.multi_reduction <add>, %65, %cst_20 [2] : vector<4x16x16xf32> to vector<4x16xf32>
    %67 = vector.shape_cast %66 : vector<4x16xf32> to vector<4x16x1xf32>
    %68 = tpu.reciprocal %67 {approx = true} : vector<4x16x1xf32> -> vector<4x16x1xf32>
    %69 = vector.broadcast %68 : vector<4x16x1xf32> to vector<4x16x16xf32>
    %70 = arith.mulf %65, %69 : vector<4x16x16xf32>
    %71 = arith.truncf %70 : vector<4x16x16xf32> to vector<4x16x16xbf16>
    "tpu.trace_start"() <{level = 10 : i32, message = "bnm,bmd->bnd"}> : () -> ()
    %cst_21 = arith.constant dense<0.000000e+00> : vector<4x16x8xf32>
    %72 = tpu.matmul %71, %59, %cst_21 {dimension_numbers = #tpu.dot_dimension_numbers<[2], [1], [1], [2], [0, 0, 0, 1, 1, 2], [0], [0]>} : vector<4x16x16xbf16>, vector<4x16x8xbf16>, vector<4x16x8xf32> -> vector<4x16x8xf32>
    "tpu.trace_stop"() : () -> ()
    %73 = vector.shape_cast %72 : vector<4x16x8xf32> to vector<64x8xf32>
    %74 = arith.truncf %73 : vector<64x8xf32> to vector<64x8xbf16>
    %75 = vector.extract_strided_slice %5 {offsets = [16, 0], sizes = [8, 32], strides = [1, 1]} : vector<32x32xbf16> to vector<8x32xbf16>
    %cst_22 = arith.constant dense<0.000000e+00> : vector<64x32xf32>
    %76 = tpu.matmul %74, %75, %cst_22 {dimension_numbers = #tpu.dot_dimension_numbers<[1], [0], [0], [1], [0, 0, 1, 1], [], []>} : vector<64x8xbf16>, vector<8x32xbf16>, vector<64x32xf32> -> vector<64x32xf32>
    %77 = arith.addf %56, %76 : vector<64x32xf32>
    %78 = vector.extract_strided_slice %13 {offsets = [0, 0, 24], sizes = [4, 16, 8], strides = [1, 1, 1]} : vector<4x16x96xbf16> to vector<4x16x8xbf16>
    %79 = vector.extract_strided_slice %13 {offsets = [0, 0, 56], sizes = [4, 16, 8], strides = [1, 1, 1]} : vector<4x16x96xbf16> to vector<4x16x8xbf16>
    %80 = vector.extract_strided_slice %13 {offsets = [0, 0, 88], sizes = [4, 16, 8], strides = [1, 1, 1]} : vector<4x16x96xbf16> to vector<4x16x8xbf16>
    "tpu.trace_start"() <{level = 10 : i32, message = "bnd,bmd->bnm"}> : () -> ()
    %cst_23 = arith.constant dense<0.000000e+00> : vector<4x16x16xf32>
    %81 = tpu.matmul %78, %79, %cst_23 {dimension_numbers = #tpu.dot_dimension_numbers<[2], [2], [1], [1], [0, 0, 0, 1, 1, 1], [0], [0]>} : vector<4x16x8xbf16>, vector<4x16x8xbf16>, vector<4x16x16xf32> -> vector<4x16x16xf32>
    "tpu.trace_stop"() : () -> ()
    %cst_24 = arith.constant dense<0xFF800000> : vector<4x16xf32>
    %82 = vector.multi_reduction <maximumf>, %81, %cst_24 [2] : vector<4x16x16xf32> to vector<4x16xf32>
    %83 = vector.shape_cast %82 : vector<4x16xf32> to vector<4x16x1xf32>
    %84 = vector.broadcast %83 : vector<4x16x1xf32> to vector<4x16x16xf32>
    %85 = arith.subf %81, %84 : vector<4x16x16xf32>
    %86 = math.exp %85 : vector<4x16x16xf32>
    %cst_25 = arith.constant dense<0.000000e+00> : vector<4x16xf32>
    %87 = vector.multi_reduction <add>, %86, %cst_25 [2] : vector<4x16x16xf32> to vector<4x16xf32>
    %88 = vector.shape_cast %87 : vector<4x16xf32> to vector<4x16x1xf32>
    %89 = tpu.reciprocal %88 {approx = true} : vector<4x16x1xf32> -> vector<4x16x1xf32>
    %90 = vector.broadcast %89 : vector<4x16x1xf32> to vector<4x16x16xf32>
    %91 = arith.mulf %86, %90 : vector<4x16x16xf32>
    %92 = arith.truncf %91 : vector<4x16x16xf32> to vector<4x16x16xbf16>
    "tpu.trace_start"() <{level = 10 : i32, message = "bnm,bmd->bnd"}> : () -> ()
    %cst_26 = arith.constant dense<0.000000e+00> : vector<4x16x8xf32>
    %93 = tpu.matmul %92, %80, %cst_26 {dimension_numbers = #tpu.dot_dimension_numbers<[2], [1], [1], [2], [0, 0, 0, 1, 1, 2], [0], [0]>} : vector<4x16x16xbf16>, vector<4x16x8xbf16>, vector<4x16x8xf32> -> vector<4x16x8xf32>
    "tpu.trace_stop"() : () -> ()
    %94 = vector.shape_cast %93 : vector<4x16x8xf32> to vector<64x8xf32>
    %95 = arith.truncf %94 : vector<64x8xf32> to vector<64x8xbf16>
    %96 = vector.extract_strided_slice %5 {offsets = [24, 0], sizes = [8, 32], strides = [1, 1]} : vector<32x32xbf16> to vector<8x32xbf16>
    %cst_27 = arith.constant dense<0.000000e+00> : vector<64x32xf32>
    %97 = tpu.matmul %95, %96, %cst_27 {dimension_numbers = #tpu.dot_dimension_numbers<[1], [0], [0], [1], [0, 0, 1, 1], [], []>} : vector<64x8xbf16>, vector<8x32xbf16>, vector<64x32xf32> -> vector<64x32xf32>
    %98 = arith.addf %77, %97 : vector<64x32xf32>
    %c0_28 = arith.constant 0 : index
    %c0_29 = arith.constant 0 : index
    %99 = vector.load %arg5[%c0_28, %c0_29] : memref<1x32xf32, #tpu.memory_space<vmem>>, vector<1x32xf32>
    %100 = vector.shape_cast %99 : vector<1x32xf32> to vector<32xf32>
    %101 = vector.shape_cast %100 : vector<32xf32> to vector<1x32xf32>
    %102 = vector.broadcast %101 : vector<1x32xf32> to vector<64x32xf32>
    %103 = arith.addf %98, %102 : vector<64x32xf32>
    %c0_30 = arith.constant 0 : index
    %c0_31 = arith.constant 0 : index
    %104 = vector.load %arg6[%c0_30, %c0_31] : memref<64x32xf32, #tpu.memory_space<vmem>>, vector<64x32xf32>
    tpu.vector_store %arg6[%c0_30, %c0_31], %103 {strides = array<i32>} : memref<64x32xf32, #tpu.memory_space<vmem>>, vector<64x32xf32>,
    return
  }
  func.func @transform_0(%arg0: i32) -> (i32, i32) {
    %c0_i32 = arith.constant 0 : i32
    %c0_i32_0 = arith.constant 0 : i32
    return %arg0, %c0_i32 : i32, i32
  }
  func.func @transform_1(%arg0: i32) -> (i32, i32) {
    %c0_i32 = arith.constant 0 : i32
    %c0_i32_0 = arith.constant 0 : i32
    %c0_i32_1 = arith.constant 0 : i32
    return %c0_i32, %c0_i32_0 : i32, i32
  }
  func.func @transform_2(%arg0: i32) -> (i32, i32) {
    %c0_i32 = arith.constant 0 : i32
    %c0_i32_0 = arith.constant 0 : i32
    %c0_i32_1 = arith.constant 0 : i32
    return %c0_i32, %c0_i32_0 : i32, i32
  }
  func.func @transform_3(%arg0: i32) -> (i32, i32) {
    %c0_i32 = arith.constant 0 : i32
    %c0_i32_0 = arith.constant 0 : i32
    %c0_i32_1 = arith.constant 0 : i32
    return %c0_i32, %c0_i32_0 : i32, i32
  }
  func.func @transform_4(%arg0: i32) -> (i32, i32) {
    %c0_i32 = arith.constant 0 : i32
    %c0_i32_0 = arith.constant 0 : i32
    %c0_i32_1 = arith.constant 0 : i32
    return %c0_i32, %c0_i32_0 : i32, i32
  }
  func.func @transform_5(%arg0: i32) -> (i32, i32) {
    %c0_i32 = arith.constant 0 : i32
    %c0_i32_0 = arith.constant 0 : i32
    return %arg0, %c0_i32 : i32, i32
  }
}

</mosaic_0001>

<bundles_post_ra>
// kernel: tpu_custom_call.1
= control target key start
LH: loop header
LB: loop body
LE: loop exit
PB: predicated region body
PF: predicated region fallthrough
CT: control target
= control target key end

     0   :  { %s3319_s18 = smov 0   ;;  %s3894_s0 = inlined_call_operand.vmem [shape: f32[128,32], index: 0, kind: input, shape index: {}]   ;;  %s3895_s1 = inlined_call_operand.vmem [shape: f32[32,96], index: 1, kind: input, shape index: {}]   ;;  %s3896_s2 = inlined_call_operand.vmem [shape: f32[1,96], index: 2, kind: input, shape index: {}]   ;;  %s3897_s3 = inlined_call_operand.vmem [shape: f32[32,32], index: 3, kind: input, shape index: {}]   ;;  %s3898_s4 = inlined_call_operand.vmem [shape: f32[1,32], index: 4, kind: input, shape index: {}]   ;;  %s3899_s5 = inlined_call_operand.vmem [shape: f32[128,32], index: 5, kind: output, shape index: {}]  }
   0x1 LB: > { %s2712_s19 = sadd.s32 4294967295, %s3274_s18   ;;  %p2716_p0 = scmp.ge.s32.totalorder %s3274_s18, 1  ;;  %s3274_s18 = sphi %s3319_s18, %s15_s18  }
   0x2   : > { %p188_p1 = scmp.lt.s32.totalorder %s3274_s18, 3 }
   0x4   : > { %p189_p2 = pnand %p2716_p0, %p188_p1 }
   0x5   : > { %s2717_s26 = sshll.u32 (!%p189_p2), %s2712_s19, 3  ;;  %s3278_s10 = smov (!%p189_p2), 96  }
   0x6   : > { %192 = sbr.rel (%p189_p2) target bundleno = 3419 (0xd5b), region = 40  ;;  %p217_p3 = scmp.lt.s32.totalorder (!%p189_p2), %s2717_s26, 15 }
   0x7   : > { %s3279_s11 = smov (!%p189_p2), 64   ;;  %s3280_s12 = smov (!%p189_p2), 88  }
   0x8   : > { %s3281_s13 = smov (!%p189_p2), 120   ;;  %s3282_s14 = smov (!%p189_p2), 56  }
   0x9   : > { %s3283_s15 = smov (!%p189_p2), 80   ;;  %s3284_s16 = smov (!%p189_p2), 112  }
   0xa   : > { %s3285_s22 = smov (!%p189_p2), 48   ;;  %s3286_s23 = smov (!%p189_p2), 72  }
   0xb   : > { %v243_v0 = vld [vmem:[%s3895_s1 + $0x10] sm:$0xff]  ;;  %v244_v1 = vld [vmem:[%s3895_s1 + $0x18] sm:$0xff]  ;;  %v241_v2 = vld [vmem:[%s3895_s1] sm:$0xff]  ;;  %s3901_s26 = smov (!%p217_p3, %s2717_s26), 15  ;;  %vm260_vm0 = vcmask 261120   ;;  %v3276_v18 = vmov 0.0  }
   0xc   : > { %v246_v3 = vpack.c.bf16 %v244_v1, %v243_v0  ;;  %v242_v4 = vld [vmem:[%s3895_s1 + $0x8] sm:$0xff]  ;;  %s2718_s29 = sshll.u32 %s3901_s26, 3  ;;  %vm3277_vm1 = vmmov 0   ;;  %v2721_v24 = vld [vmem:[%s3896_s2] ss:$0 sm:$0xff]  ;;  %vm345_vm2 = vcmask 64512  }
   0xd   : > { %v245_v5 = vpack.c.bf16 %v242_v4, %v241_v2  ;;  %s220_s7 = scalar_lea.vmem %s3894_s0, %s2718_s29  ;;  %vm543_vm3 = vcmask 130048   ;;  %vm1330_vm4 = vcmask 1043456   ;;  %s3287_s24 = smov 104  }
   0xe   : > { %2867 = vmatprep.subr.bf16.mxu0 %v246_v3  ;;  %3111 = vmatprep.subr.bf16.mxu1 %v246_v3  ;;  %v229_v6 = vld [vmem:[%s220_s7] sm:$0xff]  ;;  %v230_v7 = vld [vmem:[%s220_s7 + $0x8] sm:$0xff]  ;;  %v231_v11 = vld [vmem:[%s220_s7 + $0x10] sm:$0xff]  ;;  %s3288_s6 = smov 40  }
   0xf   : > { %2868 = vmatpush3.bf16.msra.mxu0 %v246_v3  ;;  %3113 = vmatpush3.bf16.msra.mxu1 %v246_v3  ;;  %v233_v8 = vld [vmem:[%s220_s7 + $0x20] sm:$0xff]  ;;  %v237_v9 = vpack.c.bf16 %v230_v7, %v229_v6  ;;  %v234_v10 = vld [vmem:[%s220_s7 + $0x28] sm:$0xff]  ;;  %v232_v12 = vld [vmem:[%s220_s7 + $0x18] sm:$0xff] }
  0x10   : > { %2869 = vmatprep.subr.bf16.mxu0 %v245_v5  ;;  %3112 = vmatprep.subr.bf16.mxu1 %v245_v5  ;;  %v239_v13 = vpack.c.bf16 %v234_v10, %v233_v8  ;;  %v238_v14 = vpack.c.bf16 %v232_v12, %v231_v11  ;;  %v235_v15 = vld [vmem:[%s220_s7 + $0x30] sm:$0xff]  ;;  %v236_v16 = vld [vmem:[%s220_s7 + $0x38] sm:$0xff] }
  0x11   : > { %2871 = vmatprep.mubr.msk.bf16.mxu0 %vm260_vm0, %v237_v9  ;;  %v240_v17 = vpack.c.bf16 %v236_v16, %v235_v15 }
  0x12   : > { %2875 = vmatprep.mubr.msk.bf16.mxu1 %vm260_vm0, %v239_v13 }
  0x13   : > { %2870 = vmatpush3.bf16.msra.mxu0 %v245_v5  ;;  %3114 = vmatpush3.bf16.msra.mxu1 %v245_v5 }
  0x14   : > { %2879 = vmatprep.subr.bf16.mxu1 %v3276_v18  ;;  %2891 = vmatprep.subr.bf16.mxu0 %v3276_v18 }
  0x16   : > { %2872 = vmatmul.mubr.msk.bf16.vlgmr.msra.gmra.mxu0 %vm260_vm0, %v238_v14  ;;  %2876 = vmatmul.mubr.msk.bf16.vlgmr.msra.gmra.mxu1 %vm260_vm0, %v240_v17 }
  0x17   : > { %2881 = vmatprep.mubr.msk.bf16.mxu1 %vm3277_vm1, %v3276_v18  ;;  %2893 = vmatprep.mubr.msk.bf16.mxu0 %vm3277_vm1, %v3276_v18 }
  0xd6   : > { %v2873_v19 = vpop.f32.mrf.mxu0  ;;  %v2877_v20 = vpop.f32.mrf.mxu1 }
  0xd7   : > { %v332_v34 = vadd.f32 %v2877_v20, %v2721_v24  ;;  %v316_v37 = vadd.f32 %v2873_v19, %v2721_v24 }
  0xd8   : > { %v307_v21 = vpop.f32.mrf.mxu0  ;;  %v323_v22 = vpop.f32.mrf.mxu1 }
  0xd9   : > { %v324_v26 = vadd.f32 %v2721_v24, %v323_v22  ;;  %v308_v28 = vadd.f32 %v2721_v24, %v307_v21 }
  0xda   : > { %v2874_v23 = vpop.f32.mrf.mxu0  ;;  %v2878_v25 = vpop.f32.mrf.mxu1 }
  0xdb   : > { %v319_v32 = vadd.f32 %v2874_v23, %v2721_v24  ;;  %v335_v35 = vadd.f32 %v2878_v25, %v2721_v24 }
  0xdc   : > { %v310_v27 = vpop.f32.mrf.mxu0  ;;  %v326_v30 = vpop.f32.mrf.mxu1 }
  0xdd   : > { %v311_v29 = vadd.f32 %v2721_v24, %v310_v27  ;;  %v327_v31 = vadd.f32 %v2721_v24, %v326_v30  ;;  %v3366_v38 = vpack.c.bf16 %v319_v32, %v316_v37  ;;  %v3368_v39 = vpack.c.bf16 %v335_v35, %v332_v34 }
  0xdf   : > { %v3360_v33 = vpack.c.bf16 %v311_v29, %v308_v28  ;;  %v3362_v36 = vpack.c.bf16 %v327_v31, %v324_v26 }
  0xe1   : > { %343 = vrot.lane.b32.xlu0 %v3360_v33, %s3278_s10  ;;  %444 = vrot.lane.b32.xlu1 %v3362_v36, %s3278_s10 }
  0xe5   : > { %394 = vrot.lane.b32.xlu0 %v3366_v38, %s3278_s10  ;;  %494 = vrot.lane.b32.xlu1 %v3368_v39, %s3278_s10 }
 0x153   : > { %v344_v40 = vpop.permute.xlu0 %343  ;;  %v445_v41 = vpop.permute.xlu1 %444 }
 0x154   : > { %v350_v42 = vsel %vm345_vm2, %v344_v40, 0  ;;  %v450_v43 = vsel %vm345_vm2, %v445_v41, 0 }
 0x155   : > { %2880 = vmatpush3.bf16.xpose.msra.mxu1 %v350_v42  ;;  %2892 = vmatpush3.bf16.xpose.msra.mxu0 %v450_v43 }
 0x156   : > { %2885 = vmatprep.subr.bf16.mxu1 %v3276_v18  ;;  %2903 = vmatprep.subr.bf16.mxu0 %v3276_v18 }
 0x157   : > { %v395_v44 = vpop.permute.xlu0 %394  ;;  %v495_v46 = vpop.permute.xlu1 %494 }
 0x158   : > { %v400_v45 = vsel %vm345_vm2, %v395_v44, 0  ;;  %v500_v47 = vsel %vm345_vm2, %v495_v46, 0 }
 0x15c   : > { %2882 = vmatmul.mubr.msk.bf16.vlgmr.msra.gmra.mxu1 %vm345_vm2, %v3360_v33  ;;  %2894 = vmatmul.mubr.msk.bf16.vlgmr.msra.gmra.mxu0 %vm345_vm2, %v3362_v36 }
 0x15d   : > { %2886 = vmatpush3.bf16.xpose.msra.mxu1 %v400_v45  ;;  %2887 = vmatprep.mubr.msk.bf16.mxu1 %vm3277_vm1, %v3276_v18 }
 0x15e   : > { %2897 = vmatprep.subr.bf16.mxu1 %v3276_v18  ;;  %2905 = vmatprep.mubr.msk.bf16.mxu0 %vm3277_vm1, %v3276_v18 }
 0x164   : > { %2888 = vmatmul.mubr.msk.bf16.vlgmr.msra.gmra.mxu1 %vm345_vm2, %v3366_v38 }
 0x165   : > { %2898 = vmatpush3.bf16.xpose.msra.mxu1 %v500_v47  ;;  %2899 = vmatprep.mubr.msk.bf16.mxu1 %vm3277_vm1, %v3276_v18 }
 0x166   : > { %2909 = vmatprep.subr.bf16.mxu1 %v3276_v18 }
 0x16c   : > { %2900 = vmatmul.mubr.msk.bf16.vlgmr.msra.gmra.mxu1 %vm345_vm2, %v3368_v39 }
 0x16d   : > { %2911 = vmatprep.mubr.msk.bf16.mxu1 %vm3277_vm1, %v3276_v18 }
 0x21c   : > { %v386_v48 = vpop.f32.mrf.mxu1  ;;  %v486_v49 = vpop.f32.mrf.mxu0 }
 0x21d   : > { %v544_v50 = vsel %vm543_vm3, %v386_v48, -inf  ;;  %v556_v51 = vsel %vm543_vm3, %v486_v49, -inf }
 0x21e   : > { %545 = vmax.xlane.f32.xlu0 %v544_v50  ;;  %v2883_v52 = vpop.f32.mrf.mxu1  ;;  %557 = vmax.xlane.f32.xlu1 %v556_v51  ;;  %v2895_v53 = vpop.f32.mrf.mxu0 }
 0x220   : > { %v389_v54 = vpop.f32.mrf.mxu1  ;;  %v489_v55 = vpop.f32.mrf.mxu0 }
 0x221   : > { %v547_v56 = vsel %vm543_vm3, %v389_v54, -inf  ;;  %v559_v2 = vsel %vm543_vm3, %v489_v55, -inf }
 0x222   : > { %v2884_v57 = vpop.f32.mrf.mxu1  ;;  %v2896_v58 = vpop.f32.mrf.mxu0  ;;  %548 = vmax.xlane.f32.xlu1 %v547_v56 }
 0x224   : > { %v436_v59 = vpop.f32.mrf.mxu1 }
 0x225   : > { %v550_v60 = vsel %vm543_vm3, %v436_v59, -inf }
 0x226   : > { %551 = vmax.xlane.f32.xlu0 %v550_v60  ;;  %v2889_v61 = vpop.f32.mrf.mxu1 }
 0x228   : > { %v439_v62 = vpop.f32.mrf.mxu1 }
 0x229   : > { %v553_v63 = vsel %vm543_vm3, %v439_v62, -inf }
 0x22a   : > { %554 = vmax.xlane.f32.xlu0 %v553_v63  ;;  %v2890_v0 = vpop.f32.mrf.mxu1 }
 0x22c   : > { %v536_v1 = vpop.f32.mrf.mxu1 }
 0x22d   : > { %v562_v3 = vsel %vm543_vm3, %v536_v1, -inf }
 0x22e   : > { %560 = vmax.xlane.f32.xlu0 %v559_v2  ;;  %563 = vmax.xlane.f32.xlu1 %v562_v3  ;;  %v2901_v4 = vpop.f32.mrf.mxu1 }
 0x230   : > { %v539_v5 = vpop.f32.mrf.mxu1 }
 0x231   : > { %v565_v6 = vsel %vm543_vm3, %v539_v5, -inf }
 0x232   : > { %566 = vmax.xlane.f32.xlu0 %v565_v6  ;;  %v2902_v7 = vpop.f32.mrf.mxu1 }
 0x23f   : > { %636 = vrot.lane.b32.xlu1 %v3360_v33, %s3279_s11 }
 0x2a7   : > { %v546_v8 = vpop.xlane.xlu0 %545  ;;  %v558_v9 = vpop.xlane.xlu1 %557 }
 0x2a8   : > { %v568_v10 = vsub.f32 %v386_v48, %v546_v8  ;;  %v572_v11 = vsub.f32 %v486_v49, %v558_v9 }
 0x2aa   : > { %v576_v12 = vmul.f32 1.442695, %v568_v10  ;;  %v584_v13 = vmul.f32 1.442695, %v572_v11 }
 0x2ab   : > { %v549_v14 = vpop.xlane.xlu1 %548 }
 0x2ac   : > { %3140 = vpow2.f32 %v576_v12  ;;  %v569_v15 = vsub.f32 %v389_v54, %v549_v14 }
 0x2ad   : > { %3142 = vpow2.f32 %v584_v13 }
 0x2ae   : > { %v578_v16 = vmul.f32 1.442695, %v569_v15 }
 0x2af   : > { %v552_v17 = vpop.xlane.xlu0 %551 }
 0x2b0   : > { %v570_v19 = vsub.f32 %v436_v59, %v552_v17  ;;  %3144 = vpow2.f32 %v578_v16 }
 0x2b2   : > { %v580_v20 = vmul.f32 1.442695, %v570_v19 }
 0x2b3   : > { %v555_v21 = vpop.xlane.xlu0 %554 }
 0x2b4   : > { %3146 = vpow2.f32 %v580_v20  ;;  %v571_v22 = vsub.f32 %v439_v62, %v555_v21 }
 0x2b6   : > { %v582_v30 = vmul.f32 1.442695, %v571_v22 }
 0x2b7   : > { %v564_v23 = vpop.xlane.xlu1 %563  ;;  %v561_v24 = vpop.xlane.xlu0 %560 }
 0x2b8   : > { %v573_v25 = vsub.f32 %v489_v55, %v561_v24  ;;  %v574_v45 = vsub.f32 %v536_v1, %v564_v23 }
 0x2b9   : > { %v3406_v26 = vpop.eup %3140 }
 0x2ba   : > { %v586_v27 = vmul.f32 1.442695, %v573_v25  ;;  %v592_v28 = vsel %vm543_vm3, %v3406_v26, 0.0  ;;  %v3410_v29 = vpop.eup %3142  ;;  %v588_v46 = vmul.f32 1.442695, %v574_v45 }
 0x2bb   : > { %v637_v31 = vpop.permute.xlu1 %636  ;;  %593 = vadd.xlane.f32.xlu1 %v592_v28  ;;  %v604_v34 = vsel %vm543_vm3, %v3410_v29, 0.0  ;;  %v567_v47 = vpop.xlane.xlu0 %566 }
 0x2bc   : > { %2904 = vmatpush3.bf16.msra.mxu0 %v637_v31  ;;  %3148 = vpow2.f32 %v586_v27  ;;  %v575_v48 = vsub.f32 %v539_v5, %v567_v47 }
 0x2bd   : > { %2915 = vmatprep.subr.bf16.mxu0 %v3276_v18  ;;  %v3145_v32 = vpop.eup %3144  ;;  %3150 = vpow2.f32 %v582_v30 }
 0x2be   : > { %v595_v35 = vsel %vm543_vm3, %v3145_v32, 0.0  ;;  %3152 = vpow2.f32 %v588_v46  ;;  %v590_v49 = vmul.f32 1.442695, %v575_v48 }
 0x2bf   : > { %605 = vadd.xlane.f32.xlu1 %v604_v34  ;;  %596 = vadd.xlane.f32.xlu0 %v595_v35 }
 0x2c0   : > { %3154 = vpow2.f32 %v590_v49 }
 0x2c1   : > { %v3416_v37 = vpop.eup %3146 }
 0x2c2   : > { %v598_v40 = vsel %vm543_vm3, %v3416_v37, 0.0 }
 0x2c3   : > { %599 = vadd.xlane.f32.xlu1 %v598_v40 }
 0x2c9   : > { %v3149_v41 = vpop.eup %3148 }
 0x2ca   : > { %v607_v42 = vsel %vm543_vm3, %v3149_v41, 0.0  ;;  %v3421_v43 = vpop.eup %3150 }
 0x2cb   : > { %608 = vadd.xlane.f32.xlu0 %v607_v42  ;;  %v601_v44 = vsel %vm543_vm3, %v3421_v43, 0.0  ;;  %v3431_v50 = vpop.eup %3152 }
 0x2cc   : > { %v610_v51 = vsel %vm543_vm3, %v3431_v50, 0.0 }
 0x2cd   : > { %v3435_v52 = vpop.eup %3154 }
 0x2ce   : > { %v613_v53 = vsel %vm543_vm3, %v3435_v52, 0.0 }
 0x2cf   : > { %602 = vadd.xlane.f32.xlu0 %v601_v44 }
 0x2d4   : > { %730 = vrot.lane.b32.xlu1 %v3362_v36, %s3279_s11 }
 0x2d8   : > { %777 = vrot.lane.b32.xlu1 %v3368_v39, %s3279_s11 }
 0x2e5   : > { %683 = vrot.lane.b32.xlu0 %v3366_v38, %s3279_s11  ;;  %s226_s11 = scalar_lea.vmem %s3899_s5, %s2718_s29 }
 0x2fc   : > { %611 = vadd.xlane.f32.xlu1 %v610_v51 }
 0x304   : > { %614 = vadd.xlane.f32.xlu0 %v613_v53 }
 0x30d   : > { %881 = vrot.lane.b32.xlu1 %v3366_v38, %s3280_s12 }
 0x311   : > { %932 = vrot.lane.b32.xlu1 %v3362_v36, %s3280_s12 }
 0x315   : > { %983 = vrot.lane.b32.xlu1 %v3368_v39, %s3280_s12 }
 0x319   : > { %981 = vrot.lane.b32.xlu1 %v3368_v39, %s3281_s13 }
 0x31a   : > { %830 = vrot.lane.b32.xlu0 %v3360_v33, %s3280_s12 }
 0x31e   : > { %828 = vrot.lane.b32.xlu0 %v3360_v33, %s3281_s13 }
 0x322   : > { %879 = vrot.lane.b32.xlu0 %v3366_v38, %s3281_s13 }
 0x326   : > { %930 = vrot.lane.b32.xlu0 %v3362_v36, %s3281_s13 }
 0x344   : > { %v594_v54 = vpop.xlane.xlu1 %593 }
 0x345   : > { %3156 = vrcp.f32 %v594_v54 }
 0x348   : > { %v597_v55 = vpop.xlane.xlu0 %596  ;;  %v606_v56 = vpop.xlane.xlu1 %605 }
 0x349   : > { %3158 = vrcp.f32 %v597_v55 }
 0x34a   : > { %3160 = vrcp.f32 %v606_v56 }
 0x34c   : > { %v600_v58 = vpop.xlane.xlu1 %599 }
 0x350   : > { %v731_v1 = vpop.permute.xlu1 %730 }
 0x352   : > { %v3157_v57 = vpop.eup %3156 }
 0x353   : > { %v624_v61 = vmul.f32 %v3157_v57, %v3406_v26 }
 0x354   : > { %v609_v59 = vpop.xlane.xlu0 %608  ;;  %v778_v13 = vpop.permute.xlu1 %777 }
 0x355   : > { %3162 = vrcp.f32 %v609_v59 }
 0x356   : > { %v3159_v60 = vpop.eup %3158  ;;  %3164 = vrcp.f32 %v600_v58 }
 0x357   : > { %v625_v62 = vmul.f32 %v3159_v60, %v3145_v32  ;;  %v3161_v3 = vpop.eup %3160 }
 0x358   : > { %v603_v63 = vpop.xlane.xlu0 %602  ;;  %v628_v5 = vmul.f32 %v3161_v3, %v3410_v29 }
 0x359   : > { %3166 = vrcp.f32 %v603_v63  ;;  %v632_v0 = vpack.c.bf16 %v625_v62, %v624_v61 }
 0x35b   : > { %2906 = vmatmul.mubr.msk.bf16.vlgmr.msra.gmra.mxu0 %vm543_vm3, %v632_v0 }
 0x35c   : > { %2916 = vmatpush3.bf16.msra.mxu0 %v731_v1  ;;  %v684_v2 = vpop.permute.xlu0 %683  ;;  %2917 = vmatprep.mubr.msk.bf16.mxu0 %vm3277_vm1, %v3276_v18 }
 0x35d   : > { %2910 = vmatpush3.bf16.msra.mxu1 %v684_v2  ;;  %2927 = vmatprep.subr.bf16.mxu0 %v3276_v18 }
 0x35e   : > { %2921 = vmatprep.subr.bf16.mxu1 %v3276_v18 }
 0x362   : > { %v3163_v4 = vpop.eup %3162 }
 0x363   : > { %v629_v6 = vmul.f32 %v3163_v4, %v3149_v41  ;;  %v3165_v7 = vpop.eup %3164 }
 0x364   : > { %v626_v10 = vmul.f32 %v3165_v7, %v3416_v37 }
 0x365   : > { %v634_v8 = vpack.c.bf16 %v629_v6, %v628_v5 }
 0x366   : > { %v3167_v9 = vpop.eup %3166 }
 0x367   : > { %2918 = vmatmul.mubr.msk.bf16.vlgmr.msra.gmra.mxu0 %vm543_vm3, %v634_v8  ;;  %v627_v11 = vmul.f32 %v3167_v9, %v3421_v43 }
 0x368   : > { %2929 = vmatprep.mubr.msk.bf16.mxu0 %vm3277_vm1, %v3276_v18 }
 0x369   : > { %v633_v12 = vpack.c.bf16 %v627_v11, %v626_v10 }
 0x36b   : > { %2912 = vmatmul.mubr.msk.bf16.vlgmr.msra.gmra.mxu1 %vm543_vm3, %v633_v12 }
 0x36c   : > { %2922 = vmatpush3.bf16.msra.mxu1 %v778_v13  ;;  %2923 = vmatprep.mubr.msk.bf16.mxu1 %vm3277_vm1, %v3276_v18 }
 0x36d   : > { %2933 = vmatprep.subr.bf16.mxu1 %v3276_v18 }
 0x385   : > { %v612_v14 = vpop.xlane.xlu1 %611 }
 0x386   : > { %3168 = vrcp.f32 %v612_v14 }
 0x389   : > { %v882_v16 = vpop.permute.xlu1 %881 }
 0x38a   : > { %v887_v29 = vsel %vm345_vm2, %v882_v16, 0 }
 0x38d   : > { %v615_v15 = vpop.xlane.xlu0 %614  ;;  %v933_v21 = vpop.permute.xlu1 %932 }
 0x38e   : > { %3170 = vrcp.f32 %v615_v15  ;;  %v938_v23 = vsel %vm345_vm2, %v933_v21, 0 }
 0x391   : > { %v831_v17 = vpop.permute.xlu0 %830  ;;  %v984_v31 = vpop.permute.xlu1 %983 }
 0x392   : > { %v836_v19 = vsel %vm345_vm2, %v831_v17, 0  ;;  %v989_v32 = vsel %vm345_vm2, %v984_v31, 0 }
 0x393   : > { %2928 = vmatpush3.bf16.xpose.msra.mxu0 %v836_v19  ;;  %v3169_v22 = vpop.eup %3168 }
 0x394   : > { %2939 = vmatprep.subr.bf16.mxu0 %v3276_v18  ;;  %v630_v26 = vmul.f32 %v3169_v22, %v3431_v50 }
 0x395   : > { %v829_v20 = vpop.permute.xlu0 %828  ;;  %v982_v34 = vpop.permute.xlu1 %981 }
 0x399   : > { %v880_v25 = vpop.permute.xlu0 %879 }
 0x39a   : > { %2930 = vmatmul.mubr.msk.bf16.vlgmr.msra.gmra.mxu0 %vm345_vm2, %v829_v20 }
 0x39b   : > { %v3171_v24 = vpop.eup %3170  ;;  %2940 = vmatpush3.bf16.xpose.msra.mxu0 %v938_v23  ;;  %2941 = vmatprep.mubr.msk.bf16.mxu0 %vm3277_vm1, %v3276_v18 }
 0x39c   : > { %v631_v27 = vmul.f32 %v3171_v24, %v3435_v52  ;;  %2951 = vmatprep.subr.bf16.mxu0 %v3276_v18 }
 0x39d   : > { %v931_v30 = vpop.permute.xlu0 %930 }
 0x39e   : > { %v635_v28 = vpack.c.bf16 %v631_v27, %v630_v26 }
 0x3a0   : > { %2924 = vmatmul.mubr.msk.bf16.vlgmr.msra.gmra.mxu1 %vm543_vm3, %v635_v28 }
 0x3a1   : > { %2934 = vmatpush3.bf16.xpose.msra.mxu1 %v887_v29  ;;  %2935 = vmatprep.mubr.msk.bf16.mxu1 %vm3277_vm1, %v3276_v18 }
 0x3a2   : > { %2942 = vmatmul.mubr.msk.bf16.vlgmr.msra.gmra.mxu0 %vm345_vm2, %v931_v30  ;;  %2945 = vmatprep.subr.bf16.mxu1 %v3276_v18 }
 0x3a3   : > { %2953 = vmatprep.mubr.msk.bf16.mxu0 %vm3277_vm1, %v3276_v18 }
 0x3a8   : > { %2936 = vmatmul.mubr.msk.bf16.vlgmr.msra.gmra.mxu1 %vm345_vm2, %v880_v25 }
 0x3a9   : > { %2946 = vmatpush3.bf16.xpose.msra.mxu1 %v989_v32  ;;  %2947 = vmatprep.mubr.msk.bf16.mxu1 %vm3277_vm1, %v3276_v18 }
 0x3aa   : > { %2957 = vmatprep.subr.bf16.mxu1 %v3276_v18 }
 0x3b0   : > { %2948 = vmatmul.mubr.msk.bf16.vlgmr.msra.gmra.mxu1 %vm345_vm2, %v982_v34 }
 0x3b1   : > { %2959 = vmatprep.mubr.msk.bf16.mxu1 %vm3277_vm1, %v3276_v18 }
 0x41b   : > { %v3488_v35 = vpop.f32.mrf.mxu0 }
 0x41d   : > { %v2907_v37 = vpop.f32.mrf.mxu0 }
 0x41f   : > { %v3490_v40 = vpop.f32.mrf.mxu0 }
 0x420   : > { %v824_v41 = vpack.c.bf16 %v3490_v40, %v3488_v35 }
 0x421   : > { %v2908_v42 = vpop.f32.mrf.mxu0 }
 0x427   : > { %v3494_v43 = vpop.f32.mrf.mxu0 }
 0x429   : > { %v2919_v44 = vpop.f32.mrf.mxu0 }
 0x42b   : > { %v3496_v45 = vpop.f32.mrf.mxu1  ;;  %v3498_v46 = vpop.f32.mrf.mxu0 }
 0x42c   : > { %v826_v47 = vpack.c.bf16 %v3498_v46, %v3494_v43 }
 0x42d   : > { %v2913_v48 = vpop.f32.mrf.mxu1  ;;  %v2920_v49 = vpop.f32.mrf.mxu0 }
 0x42f   : > { %v3502_v50 = vpop.f32.mrf.mxu1 }
 0x430   : > { %v825_v51 = vpack.c.bf16 %v3502_v50, %v3496_v45 }
 0x431   : > { %v2914_v52 = vpop.f32.mrf.mxu1 }
 0x45a   : > { %v872_v53 = vpop.f32.mrf.mxu0 }
 0x45b   : > { %v1032_v54 = vsel %vm543_vm3, %v872_v53, -inf }
 0x45c   : > { %1033 = vmax.xlane.f32.xlu0 %v1032_v54  ;;  %v2931_v55 = vpop.f32.mrf.mxu0 }
 0x45e   : > { %v875_v56 = vpop.f32.mrf.mxu0 }
 0x45f   : > { %v1035_v57 = vsel %vm543_vm3, %v875_v56, -inf }
 0x460   : > { %v3508_v58 = vpop.f32.mrf.mxu1  ;;  %1036 = vmax.xlane.f32.xlu1 %v1035_v57  ;;  %v2932_v59 = vpop.f32.mrf.mxu0 }
 0x462   : > { %v2925_v60 = vpop.f32.mrf.mxu1  ;;  %v974_v61 = vpop.f32.mrf.mxu0 }
 0x463   : > { %v1044_v62 = vsel %vm543_vm3, %v974_v61, -inf }
 0x464   : > { %v3511_v63 = vpop.f32.mrf.mxu1  ;;  %1045 = vmax.xlane.f32.xlu1 %v1044_v62  ;;  %v2943_v0 = vpop.f32.mrf.mxu0 }
 0x465   : > { %v827_v1 = vpack.c.bf16 %v3511_v63, %v3508_v58 }
 0x466   : > { %v2926_v2 = vpop.f32.mrf.mxu1  ;;  %v977_v3 = vpop.f32.mrf.mxu0 }
 0x467   : > { %v1047_v13 = vsel %vm543_vm3, %v977_v3, -inf }
 0x468   : > { %v923_v4 = vpop.f32.mrf.mxu1  ;;  %v2944_v5 = vpop.f32.mrf.mxu0 }
 0x469   : > { %v1038_v6 = vsel %vm543_vm3, %v923_v4, -inf }
 0x46a   : > { %1039 = vmax.xlane.f32.xlu0 %v1038_v6  ;;  %v2937_v7 = vpop.f32.mrf.mxu1 }
 0x46c   : > { %v926_v8 = vpop.f32.mrf.mxu1 }
 0x46d   : > { %v1041_v9 = vsel %vm543_vm3, %v926_v8, -inf }
 0x46e   : > { %1042 = vmax.xlane.f32.xlu0 %v1041_v9  ;;  %v2938_v10 = vpop.f32.mrf.mxu1 }
 0x470   : > { %v1025_v11 = vpop.f32.mrf.mxu1 }
 0x471   : > { %v1050_v12 = vsel %vm543_vm3, %v1025_v11, -inf }
 0x472   : > { %v2949_v14 = vpop.f32.mrf.mxu1  ;;  %1051 = vmax.xlane.f32.xlu1 %v1050_v12  ;;  %1048 = vmax.xlane.f32.xlu0 %v1047_v13 }
 0x474   : > { %v1028_v15 = vpop.f32.mrf.mxu1 }
 0x475   : > { %v1053_v16 = vsel %vm543_vm3, %v1028_v15, -inf }
 0x476   : > { %v2950_v17 = vpop.f32.mrf.mxu1  ;;  %1054 = vmax.xlane.f32.xlu0 %v1053_v16 }
 0x483   : > { %1124 = vrot.lane.b32.xlu1 %v3360_v33, %s3282_s14 }
 0x4e5   : > { %v1034_v19 = vpop.xlane.xlu0 %1033 }
 0x4e6   : > { %v1056_v20 = vsub.f32 %v872_v53, %v1034_v19 }
 0x4e8   : > { %v1064_v21 = vmul.f32 1.442695, %v1056_v20 }
 0x4e9   : > { %v1037_v22 = vpop.xlane.xlu1 %1036 }
 0x4ea   : > { %3172 = vpow2.f32 %v1064_v21  ;;  %v1057_v23 = vsub.f32 %v875_v56, %v1037_v22 }
 0x4ec   : > { %v1066_v24 = vmul.f32 1.442695, %v1057_v23 }
 0x4ed   : > { %v1046_v25 = vpop.xlane.xlu1 %1045 }
 0x4ee   : > { %3174 = vpow2.f32 %v1066_v24  ;;  %v1060_v26 = vsub.f32 %v974_v61, %v1046_v25 }
 0x4f0   : > { %v1072_v29 = vmul.f32 1.442695, %v1060_v26 }
 0x4f3   : > { %v1040_v27 = vpop.xlane.xlu0 %1039 }
 0x4f4   : > { %v1058_v28 = vsub.f32 %v923_v4, %v1040_v27 }
 0x4f6   : > { %v1068_v30 = vmul.f32 1.442695, %v1058_v28 }
 0x4f7   : > { %v3522_v31 = vpop.eup %3172  ;;  %v1043_v32 = vpop.xlane.xlu0 %1042 }
 0x4f8   : > { %3176 = vpow2.f32 %v1068_v30  ;;  %v1059_v34 = vsub.f32 %v926_v8, %v1043_v32  ;;  %v1080_v37 = vsel %vm543_vm3, %v3522_v31, 0.0  ;;  %v247_v30 = vld [vmem:[%s3897_s3] sm:$0xff] }
 0x4f9   : > { %1081 = vadd.xlane.f32.xlu1 %v1080_v37  ;;  %3178 = vpow2.f32 %v1072_v29 }
 0x4fa   : > { %v1070_v42 = vmul.f32 1.442695, %v1059_v34 }
 0x4fb   : > { %v3175_v44 = vpop.eup %3174  ;;  %v1052_v48 = vpop.xlane.xlu1 %1051 }
 0x4fc   : > { %v1049_v49 = vpop.xlane.xlu0 %1048  ;;  %3180 = vpow2.f32 %v1070_v42  ;;  %v1062_v52 = vsub.f32 %v1025_v11, %v1052_v48  ;;  %v1083_v54 = vsel %vm543_vm3, %v3175_v44, 0.0 }
 0x4fd   : > { %v1061_v53 = vsub.f32 %v977_v3, %v1049_v49  ;;  %1084 = vadd.xlane.f32.xlu0 %v1083_v54 }
 0x4fe   : > { %v1076_v55 = vmul.f32 1.442695, %v1062_v52 }
 0x4ff   : > { %v1074_v56 = vmul.f32 1.442695, %v1061_v53  ;;  %v1125_v57 = vpop.permute.xlu1 %1124 }
 0x500   : > { %v1055_v59 = vpop.xlane.xlu0 %1054  ;;  %3182 = vpow2.f32 %v1076_v55  ;;  %2952 = vmatpush3.bf16.msra.mxu0 %v1125_v57 }
 0x501   : > { %v1063_v60 = vsub.f32 %v1028_v15, %v1055_v59  ;;  %3184 = vpow2.f32 %v1074_v56  ;;  %2963 = vmatprep.subr.bf16.mxu0 %v3276_v18 }
 0x503   : > { %v1078_v61 = vmul.f32 1.442695, %v1063_v60 }
 0x505   : > { %3186 = vpow2.f32 %v1078_v61  ;;  %v3528_v62 = vpop.eup %3176 }
 0x506   : > { %v1086_v0 = vsel %vm543_vm3, %v3528_v62, 0.0  ;;  %v3532_v2 = vpop.eup %3178 }
 0x507   : > { %1087 = vadd.xlane.f32.xlu1 %v1086_v0  ;;  %v1092_v4 = vsel %vm543_vm3, %v3532_v2, 0.0 }
 0x509   : > { %v3181_v3 = vpop.eup %3180 }
 0x50a   : > { %v1089_v5 = vsel %vm543_vm3, %v3181_v3, 0.0 }
 0x50b   : > { %1093 = vadd.xlane.f32.xlu1 %v1092_v4  ;;  %1090 = vadd.xlane.f32.xlu0 %v1089_v5 }
 0x50d   : > { %v3537_v6 = vpop.eup %3182 }
 0x50e   : > { %v3539_v7 = vpop.eup %3184  ;;  %v1098_v8 = vsel %vm543_vm3, %v3537_v6, 0.0 }
 0x50f   : > { %1099 = vadd.xlane.f32.xlu1 %v1098_v8  ;;  %v1095_v9 = vsel %vm543_vm3, %v3539_v7, 0.0 }
 0x510   : > { %1096 = vadd.xlane.f32.xlu0 %v1095_v9 }
 0x512   : > { %v3545_v10 = vpop.eup %3186 }
 0x513   : > { %v1101_v11 = vsel %vm543_vm3, %v3545_v10, 0.0 }
 0x514   : > { %1102 = vadd.xlane.f32.xlu0 %v1101_v11 }
 0x520   : > { %1218 = vrot.lane.b32.xlu1 %v3362_v36, %s3282_s14 }
 0x524   : > { %1265 = vrot.lane.b32.xlu1 %v3368_v39, %s3282_s14 }
 0x528   : > { %1532 = vrot.lane.b32.xlu1 %v3366_v38, %s3283_s15 }
 0x52a   : > { %1171 = vrot.lane.b32.xlu0 %v3366_v38, %s3282_s14 }
 0x52c   : > { %1583 = vrot.lane.b32.xlu1 %v3362_v36, %s3283_s15 }
 0x52e   : > { %1481 = vrot.lane.b32.xlu0 %v3360_v33, %s3283_s15 }
 0x530   : > { %1634 = vrot.lane.b32.xlu1 %v3368_v39, %s3283_s15 }
 0x532   : > { %1479 = vrot.lane.b32.xlu0 %v3360_v33, %s3284_s16 }
 0x534   : > { %1632 = vrot.lane.b32.xlu1 %v3368_v39, %s3284_s16 }
 0x536   : > { %1530 = vrot.lane.b32.xlu0 %v3366_v38, %s3284_s16 }
 0x53a   : > { %1581 = vrot.lane.b32.xlu0 %v3362_v36, %s3284_s16 }
 0x582   : > { %v1082_v12 = vpop.xlane.xlu1 %1081 }
 0x583   : > { %3188 = vrcp.f32 %v1082_v12 }
 0x586   : > { %v1085_v13 = vpop.xlane.xlu0 %1084 }
 0x587   : > { %3190 = vrcp.f32 %v1085_v13 }
 0x590   : > { %v1088_v14 = vpop.xlane.xlu1 %1087  ;;  %v3189_v15 = vpop.eup %3188 }
 0x591   : > { %3192 = vrcp.f32 %v1088_v14  ;;  %v1112_v20 = vmul.f32 %v3189_v15, %v3522_v31  ;;  %v248_v31 = vld [vmem:[%s3897_s3 + $0x8] sm:$0xff] }
 0x594   : > { %v3191_v16 = vpop.eup %3190  ;;  %v1094_v17 = vpop.xlane.xlu1 %1093 }
 0x595   : > { %v1091_v19 = vpop.xlane.xlu0 %1090  ;;  %v1113_v21 = vmul.f32 %v3191_v16, %v3175_v44  ;;  %v251_v44 = vpack.c.bf16 %v248_v31, %v247_v30 }
 0x596   : > { %3194 = vrcp.f32 %v1091_v19 }
 0x597   : > { %v1120_v22 = vpack.c.bf16 %v1113_v21, %v1112_v20  ;;  %3196 = vrcp.f32 %v1094_v17  ;;  %v1412_v61 = vsel %vm1330_vm4, %v251_v44, 0  ;;  %v1317_v46 = vrot.slane %v251_v44, 4 }
 0x598   : > { %v1100_v23 = vpop.xlane.xlu1 %1099 }
 0x599   : > { %v1097_v24 = vpop.xlane.xlu0 %1096  ;;  %2954 = vmatmul.mubr.msk.bf16.vlgmr.msra.gmra.mxu0 %vm543_vm3, %v1120_v22 }
 0x59a   : > { %3198 = vrcp.f32 %v1097_v24  ;;  %2965 = vmatprep.mubr.msk.bf16.mxu0 %vm3277_vm1, %v3276_v18 }
 0x59b   : > { %3200 = vrcp.f32 %v1100_v23 }
 0x59c   : > { %v1219_v25 = vpop.permute.xlu1 %1218 }
 0x59d   : > { %v1103_v26 = vpop.xlane.xlu0 %1102  ;;  %2964 = vmatpush3.bf16.msra.mxu0 %v1219_v25 }
 0x59e   : > { %3202 = vrcp.f32 %v1103_v26  ;;  %v3193_v27 = vpop.eup %3192  ;;  %3115 = vmatprep.subr.msk.bf16.mxu0 %vm1330_vm4, %v1317_v46 }
 0x59f   : > { %v1114_v32 = vmul.f32 %v3193_v27, %v3528_v62 }
 0x5a0   : > { %v1266_v49 = vpop.permute.xlu1 %1265 }
 0x5a1   : > { %v1172_v28 = vpop.permute.xlu0 %1171 }
 0x5a2   : > { %2958 = vmatpush3.bf16.msra.mxu1 %v1172_v28 }
 0x5a3   : > { %v3195_v29 = vpop.eup %3194  ;;  %2969 = vmatprep.subr.bf16.mxu1 %v3276_v18 }
 0x5a4   : > { %v1115_v34 = vmul.f32 %v3195_v29, %v3181_v3  ;;  %v3197_v37 = vpop.eup %3196  ;;  %v1533_v62 = vpop.permute.xlu1 %1532 }
 0x5a5   : > { %v1116_v52 = vmul.f32 %v3197_v37, %v3532_v2  ;;  %v1538_v0 = vsel %vm345_vm2, %v1533_v62, 0  ;;  %v1482_v35 = vpop.permute.xlu0 %1481 }
 0x5a6   : > { %v1121_v42 = vpack.c.bf16 %v1115_v34, %v1114_v32  ;;  %v1487_v11 = vsel %vm345_vm2, %v1482_v35, 0 }
 0x5a7   : > { %v3199_v48 = vpop.eup %3198 }
 0x5a8   : > { %2960 = vmatmul.mubr.msk.bf16.vlgmr.msra.gmra.mxu1 %vm543_vm3, %v1121_v42  ;;  %v1117_v53 = vmul.f32 %v3199_v48, %v3539_v7  ;;  %v3201_v54 = vpop.eup %3200  ;;  %v1584_v40 = vpop.permute.xlu1 %1583 }
 0x5a9   : > { %2970 = vmatpush3.bf16.msra.mxu1 %v1266_v49  ;;  %2971 = vmatprep.mubr.msk.bf16.mxu1 %vm3277_vm1, %v3276_v18  ;;  %v1118_v57 = vmul.f32 %v3201_v54, %v3537_v6  ;;  %v1589_v25 = vsel %vm345_vm2, %v1584_v40, 0 }
 0x5aa   : > { %v1122_v55 = vpack.c.bf16 %v1117_v53, %v1116_v52  ;;  %3116 = vmatprep.subr.msk.bf16.mxu1 %vm1330_vm4, %v251_v44 }
 0x5ab   : > { %v3203_v56 = vpop.eup %3202 }
 0x5ac   : > { %2966 = vmatmul.mubr.msk.bf16.vlgmr.msra.gmra.mxu0 %vm543_vm3, %v1122_v55  ;;  %v1119_v59 = vmul.f32 %v3203_v56, %v3545_v10  ;;  %v1635_v45 = vpop.permute.xlu1 %1634 }
 0x5ae   : > { %v1123_v60 = vpack.c.bf16 %v1119_v59, %v1118_v57 }
 0x5b0   : > { %2972 = vmatmul.mubr.msk.bf16.vlgmr.msra.gmra.mxu1 %vm543_vm3, %v1123_v60  ;;  %v1633_v43 = vpop.permute.xlu1 %1632 }
 0x5b1   : > { %2987 = vmatprep.mubr.msk.bf16.mxu1 %vm345_vm2, %v824_v41  ;;  %2986 = vmatpush3.bf16.msra.mxu1 %v1412_v61  ;;  %v1480_v41 = vpop.permute.xlu0 %1479 }
 0x5b2   : > { %3001 = vmatprep.subr.bf16.mxu1 %v3276_v18 }
 0x5b5   : > { %v1531_v50 = vpop.permute.xlu0 %1530 }
 0x5b8   : > { %2988 = vmatmul.mubr.msk.bf16.vlgmr.msra.gmra.mxu1 %vm345_vm2, %v825_v51  ;;  %v1640_v51 = vsel %vm345_vm2, %v1635_v45, 0 }
 0x5b9   : > { %3002 = vmatpush3.bf16.xpose.msra.mxu1 %v1538_v0  ;;  %2991 = vmatprep.mubr.msk.bf16.mxu1 %vm345_vm2, %v826_v47  ;;  %v1332_v47 = vsel %vm1330_vm4, %v1317_v46, 0  ;;  %v1582_v29 = vpop.permute.xlu0 %1581 }
 0x5ba   : > { %3013 = vmatprep.subr.bf16.mxu1 %v3276_v18  ;;  %2976 = vmatpush3.bf16.msra.mxu0 %v1332_v47 }
 0x5bb   : > { %2995 = vmatprep.subr.bf16.mxu0 %v3276_v18 }
 0x5c0   : > { %2992 = vmatmul.mubr.msk.bf16.gmra.mxu1 %vm345_vm2, %v827_v1 }
 0x5c1   : > { %3003 = vmatprep.mubr.msk.bf16.mxu1 %vm3277_vm1, %v3276_v18 }
 0x5c8   : > { %3004 = vmatmul.mubr.msk.bf16.vlgmr.msra.gmra.mxu1 %vm345_vm2, %v1531_v50 }
 0x5c9   : > { %3014 = vmatpush3.bf16.xpose.msra.mxu1 %v1640_v51  ;;  %3015 = vmatprep.mubr.msk.bf16.mxu1 %vm3277_vm1, %v3276_v18 }
 0x5ca   : > { %3025 = vmatprep.subr.bf16.mxu1 %v3276_v18 }
 0x5d0   : > { %3016 = vmatmul.mubr.msk.bf16.vlgmr.msra.gmra.mxu1 %vm345_vm2, %v1633_v43 }
 0x5d1   : > { %3027 = vmatprep.mubr.msk.bf16.mxu1 %vm3277_vm1, %v3276_v18 }
 0x659   : > { %v1164_v58 = vpop.f32.mrf.mxu0 }
 0x65b   : > { %v2955_v63 = vpop.f32.mrf.mxu0 }
 0x65d   : > { %v1167_v1 = vpop.f32.mrf.mxu0 }
 0x65e   : > { %v1312_v2 = vpack.c.bf16 %v1167_v1, %v1164_v58 }
 0x65f   : > { %v2956_v3 = vpop.f32.mrf.mxu0 }
 0x660   : > { %2977 = vmatprep.mubr.msk.bf16.mxu0 %vm345_vm2, %v1312_v2 }
 0x668   : > { %v1211_v4 = vpop.f32.mrf.mxu1 }
 0x66a   : > { %v2961_v5 = vpop.f32.mrf.mxu1 }
 0x66c   : > { %v1214_v6 = vpop.f32.mrf.mxu1  ;;  %v1258_v7 = vpop.f32.mrf.mxu0 }
 0x66d   : > { %v1313_v8 = vpack.c.bf16 %v1214_v6, %v1211_v4 }
 0x66e   : > { %v2962_v9 = vpop.f32.mrf.mxu1  ;;  %v2967_v10 = vpop.f32.mrf.mxu0 }
 0x66f   : > { %2978 = vmatmul.mubr.msk.bf16.vlgmr.msra.gmra.mxu0 %vm345_vm2, %v1313_v8 }
 0x670   : > { %2996 = vmatpush3.bf16.xpose.msra.mxu0 %v1487_v11  ;;  %v1261_v12 = vpop.f32.mrf.mxu0  ;;  %v1305_v13 = vpop.f32.mrf.mxu1 }
 0x671   : > { %v1314_v14 = vpack.c.bf16 %v1261_v12, %v1258_v7  ;;  %3007 = vmatprep.subr.bf16.mxu0 %v3276_v18 }
 0x672   : > { %v2968_v15 = vpop.f32.mrf.mxu0  ;;  %v2973_v16 = vpop.f32.mrf.mxu1 }
 0x673   : > { %2981 = vmatprep.mubr.msk.bf16.mxu0 %vm345_vm2, %v1314_v14 }
 0x674   : > { %v1308_v17 = vpop.f32.mrf.mxu1 }
 0x675   : > { %v1315_v19 = vpack.c.bf16 %v1308_v17, %v1305_v13 }
 0x676   : > { %v2974_v20 = vpop.f32.mrf.mxu1 }
 0x677   : > { %2982 = vmatmul.mubr.msk.bf16.gmra.mxu0 %vm345_vm2, %v1315_v19 }
 0x678   : > { %v3624_v21 = vpop.f32.mrf.mxu1  ;;  %2997 = vmatprep.mubr.msk.bf16.mxu0 %vm3277_vm1, %v3276_v18 }
 0x67a   : > { %v3628_v22 = vpop.f32.mrf.mxu1 }
 0x67c   : > { %v3630_v23 = vpop.f32.mrf.mxu1 }
 0x67e   : > { %v3632_v24 = vpop.f32.mrf.mxu1 }
 0x67f   : > { %2998 = vmatmul.mubr.msk.bf16.vlgmr.msra.gmra.mxu0 %vm345_vm2, %v1480_v41 }
 0x680   : > { %3008 = vmatpush3.bf16.xpose.msra.mxu0 %v1589_v25  ;;  %v3636_v26 = vpop.f32.mrf.mxu1  ;;  %3009 = vmatprep.mubr.msk.bf16.mxu0 %vm3277_vm1, %v3276_v18 }
 0x681   : > { %3019 = vmatprep.subr.bf16.mxu0 %v3276_v18 }
 0x682   : > { %v3641_v27 = vpop.f32.mrf.mxu1 }
 0x684   : > { %v3643_v28 = vpop.f32.mrf.mxu1 }
 0x686   : > { %v3645_v30 = vpop.f32.mrf.mxu1 }
 0x687   : > { %3010 = vmatmul.mubr.msk.bf16.vlgmr.msra.gmra.mxu0 %vm345_vm2, %v1582_v29 }
 0x688   : > { %v1574_v31 = vpop.f32.mrf.mxu1  ;;  %3021 = vmatprep.mubr.msk.bf16.mxu0 %vm3277_vm1, %v3276_v18 }
 0x689   : > { %v1689_v41 = vsel %vm543_vm3, %v1574_v31, -inf }
 0x68a   : > { %v3005_v32 = vpop.f32.mrf.mxu1 }
 0x68c   : > { %v1577_v34 = vpop.f32.mrf.mxu1 }
 0x68d   : > { %v1692_v51 = vsel %vm543_vm3, %v1577_v34, -inf }
 0x68e   : > { %v3006_v37 = vpop.f32.mrf.mxu1 }
 0x690   : > { %v1676_v42 = vpop.f32.mrf.mxu1 }
 0x691   : > { %v1701_v58 = vsel %vm543_vm3, %v1676_v42, -inf }
 0x692   : > { %v3017_v44 = vpop.f32.mrf.mxu1 }
 0x694   : > { %v1679_v48 = vpop.f32.mrf.mxu1 }
 0x695   : > { %v1704_v2 = vsel %vm543_vm3, %v1679_v48, -inf }
 0x696   : > { %v3018_v49 = vpop.f32.mrf.mxu1 }
 0x72f   : > { %v3650_v52 = vpop.f32.mrf.mxu0 }
 0x731   : > { %v3652_v53 = vpop.f32.mrf.mxu0 }
 0x733   : > { %v3654_v54 = vpop.f32.mrf.mxu0 }
 0x735   : > { %v3656_v55 = vpop.f32.mrf.mxu0 }
 0x737   : > { %v3658_v56 = vpop.f32.mrf.mxu0 }
 0x739   : > { %v3660_v57 = vpop.f32.mrf.mxu0 }
 0x73b   : > { %v3662_v59 = vpop.f32.mrf.mxu0 }
 0x73d   : > { %v3664_v60 = vpop.f32.mrf.mxu0 }
 0x73f   : > { %v3666_v61 = vpop.f32.mrf.mxu0 }
 0x740   : > { %v1683_v62 = vsel %vm543_vm3, %v3666_v61, -inf }
 0x741   : > { %1684 = vmax.xlane.f32.xlu0 %v1683_v62  ;;  %v2999_v0 = vpop.f32.mrf.mxu0 }
 0x743   : > { %v1526_v35 = vpop.f32.mrf.mxu0 }
 0x744   : > { %v1686_v40 = vsel %vm543_vm3, %v1526_v35, -inf }
 0x745   : > { %1687 = vmax.xlane.f32.xlu1 %v1686_v40  ;;  %v3000_v45 = vpop.f32.mrf.mxu0  ;;  %1690 = vmax.xlane.f32.xlu0 %v1689_v41 }
 0x747   : > { %v3672_v50 = vpop.f32.mrf.mxu0 }
 0x748   : > { %v1695_v43 = vsel %vm543_vm3, %v3672_v50, -inf }
 0x749   : > { %1693 = vmax.xlane.f32.xlu0 %v1692_v51  ;;  %1696 = vmax.xlane.f32.xlu1 %v1695_v43  ;;  %v3011_v46 = vpop.f32.mrf.mxu0 }
 0x74b   : > { %v1628_v47 = vpop.f32.mrf.mxu0 }
 0x74c   : > { %v1698_v63 = vsel %vm543_vm3, %v1628_v47, -inf }
 0x74d   : > { %1702 = vmax.xlane.f32.xlu1 %v1701_v58  ;;  %1699 = vmax.xlane.f32.xlu0 %v1698_v63  ;;  %v3012_v1 = vpop.f32.mrf.mxu0 }
 0x751   : > { %1705 = vmax.xlane.f32.xlu0 %v1704_v2 }
 0x7ca   : > { %v1685_v3 = vpop.xlane.xlu0 %1684 }
 0x7cb   : > { %v1707_v45 = vsub.f32 %v3666_v61, %v1685_v3 }
 0x7cd   : > { %v1715_v51 = vmul.f32 1.442695, %v1707_v45 }
 0x7ce   : > { %v1688_v4 = vpop.xlane.xlu1 %1687  ;;  %v1691_v5 = vpop.xlane.xlu0 %1690 }
 0x7cf   : > { %v1709_v6 = vsub.f32 %v1574_v31, %v1691_v5  ;;  %v1708_v15 = vsub.f32 %v1526_v35, %v1688_v4 }
 0x7d1   : > { %v1719_v7 = vmul.f32 1.442695, %v1709_v6  ;;  %v1717_v20 = vmul.f32 1.442695, %v1708_v15 }
 0x7d2   : > { %v1697_v8 = vpop.xlane.xlu1 %1696  ;;  %v1694_v9 = vpop.xlane.xlu0 %1693 }
 0x7d3   : > { %v1710_v10 = vsub.f32 %v1577_v34, %v1694_v9  ;;  %3204 = vpow2.f32 %v1719_v7  ;;  %v1711_v43 = vsub.f32 %v3672_v50, %v1697_v8 }
 0x7d5   : > { %v1721_v11 = vmul.f32 1.442695, %v1710_v10  ;;  %v1723_v46 = vmul.f32 1.442695, %v1711_v43 }
 0x7d6   : > { %v1703_v12 = vpop.xlane.xlu1 %1702  ;;  %v1700_v13 = vpop.xlane.xlu0 %1699 }
 0x7d7   : > { %v1713_v14 = vsub.f32 %v1676_v42, %v1703_v12  ;;  %3206 = vpow2.f32 %v1721_v11  ;;  %v1712_v25 = vsub.f32 %v1628_v47, %v1700_v13 }
 0x7d9   : > { %v1727_v16 = vmul.f32 1.442695, %v1713_v14  ;;  %v1725_v32 = vmul.f32 1.442695, %v1712_v25 }
 0x7da   : > { %v1706_v17 = vpop.xlane.xlu0 %1705 }
 0x7db   : > { %3208 = vpow2.f32 %v1727_v16  ;;  %v1714_v19 = vsub.f32 %v1679_v48, %v1706_v17 }
 0x7dd   : > { %v1729_v29 = vmul.f32 1.442695, %v1714_v19 }
 0x7df   : > { %3210 = vpow2.f32 %v1729_v29 }
 0x7e0   : > { %v3680_v31 = vpop.eup %3204  ;;  %3212 = vpow2.f32 %v1717_v20 }
 0x7e1   : > { %v1737_v34 = vsel %vm543_vm3, %v3680_v31, 0.0  ;;  %3214 = vpow2.f32 %v1725_v32 }
 0x7e2   : > { %1738 = vadd.xlane.f32.xlu1 %v1737_v34  ;;  %3216 = vpow2.f32 %v1715_v51 }
 0x7e3   : > { %3218 = vpow2.f32 %v1723_v46 }
 0x7e4   : > { %v3207_v37 = vpop.eup %3206 }
 0x7e5   : > { %v1740_v42 = vsel %vm543_vm3, %v3207_v37, 0.0 }
 0x7e6   : > { %1741 = vadd.xlane.f32.xlu0 %v1740_v42 }
 0x7e8   : > { %v3685_v44 = vpop.eup %3208 }
 0x7e9   : > { %v1749_v48 = vsel %vm543_vm3, %v3685_v44, 0.0 }
 0x7ea   : > { %1750 = vadd.xlane.f32.xlu1 %v1749_v48 }
 0x7ec   : > { %v3689_v49 = vpop.eup %3210 }
 0x7ed   : > { %v1752_v62 = vsel %vm543_vm3, %v3689_v49, 0.0  ;;  %v3693_v0 = vpop.eup %3212 }
 0x7ee   : > { %1753 = vadd.xlane.f32.xlu0 %v1752_v62  ;;  %v1734_v35 = vsel %vm543_vm3, %v3693_v0, 0.0  ;;  %v3697_v40 = vpop.eup %3214 }
 0x7ef   : > { %v1746_v41 = vsel %vm543_vm3, %v3697_v40, 0.0  ;;  %v3217_v47 = vpop.eup %3216 }
 0x7f0   : > { %v1731_v61 = vsel %vm543_vm3, %v3217_v47, 0.0  ;;  %v3710_v58 = vpop.eup %3218 }
 0x7f1   : > { %v1743_v50 = vsel %vm543_vm3, %v3710_v58, 0.0 }
 0x7f2   : > { %1735 = vadd.xlane.f32.xlu0 %v1734_v35 }
 0x7f6   : > { %1747 = vadd.xlane.f32.xlu0 %v1746_v41 }
 0x7fb   : > { %1775 = vrot.lane.b32.xlu1 %v3360_v33, %s3285_s22 }
 0x80c   : > { %1822 = vrot.lane.b32.xlu0 %v3366_v38, %s3285_s22 }
 0x810   : > { %2057 = vrot.lane.b32.xlu0 %v3360_v33, %s3286_s23 }
 0x814   : > { %2108 = vrot.lane.b32.xlu0 %v3366_v38, %s3286_s23 }
 0x818   : > { %2106 = vrot.lane.b32.xlu0 %v3366_v38, %s3287_s24 }
 0x81c   : > { %2157 = vrot.lane.b32.xlu0 %v3362_v36, %s3287_s24 }
 0x81f   : > { %1732 = vadd.xlane.f32.xlu1 %v1731_v61 }
 0x823   : > { %1744 = vadd.xlane.f32.xlu1 %v1743_v50  ;;  %v249_v50 = vld [vmem:[%s3897_s3 + $0x10] sm:$0xff] }
 0x834   : > { %1869 = vrot.lane.b32.xlu1 %v3362_v36, %s3285_s22 }
 0x838   : > { %1916 = vrot.lane.b32.xlu1 %v3368_v39, %s3285_s22 }
 0x83c   : > { %2055 = vrot.lane.b32.xlu1 %v3360_v33, %s3287_s24 }
 0x840   : > { %2159 = vrot.lane.b32.xlu1 %v3362_v36, %s3286_s23 }
 0x844   : > { %2210 = vrot.lane.b32.xlu1 %v3368_v39, %s3286_s23 }
 0x848   : > { %2208 = vrot.lane.b32.xlu1 %v3368_v39, %s3287_s24 }
 0x86b   : > { %v1739_v63 = vpop.xlane.xlu1 %1738 }
 0x86f   : > { %v1742_v1 = vpop.xlane.xlu0 %1741 }
 0x870   : > { %3220 = vrcp.f32 %v1742_v1 }
 0x871   : > { %3222 = vrcp.f32 %v1739_v63  ;;  %v250_v63 = vld [vmem:[%s3897_s3 + $0x18] sm:$0xff] }
 0x872   : > { %v3760_v1 = vpack.c.bf16 %v250_v63, %v249_v50  ;;  %v1457_v50 = vadd.f32 %v3624_v21, %v3650_v52  ;;  %v1452_v21 = vadd.f32 %v3632_v24, %v3656_v55 }
 0x873   : > { %v1751_v2 = vpop.xlane.xlu1 %1750 }
 0x877   : > { %v1776_v3 = vpop.permute.xlu1 %1775  ;;  %v1754_v4 = vpop.xlane.xlu0 %1753 }
 0x878   : > { %3020 = vmatpush3.bf16.msra.mxu0 %v1776_v3  ;;  %3224 = vrcp.f32 %v1754_v4 }
 0x879   : > { %3031 = vmatprep.subr.bf16.mxu0 %v3276_v18  ;;  %3226 = vrcp.f32 %v1751_v2  ;;  %v1980_v2 = vsel %vm1330_vm4, %v3760_v1, 0 }
 0x87b   : > { %v1736_v5 = vpop.xlane.xlu0 %1735 }
 0x87c   : > { %3228 = vrcp.f32 %v1736_v5 }
 0x87d   : > { %v3221_v6 = vpop.eup %3220 }
 0x87e   : > { %v3223_v8 = vpop.eup %3222  ;;  %v1766_v9 = vmul.f32 %v3221_v6, %v3207_v37 }
 0x87f   : > { %v1748_v7 = vpop.xlane.xlu0 %1747  ;;  %v1765_v11 = vmul.f32 %v3223_v8, %v3680_v31 }
 0x881   : > { %v1772_v12 = vpack.c.bf16 %v1766_v9, %v1765_v11 }
 0x883   : > { %v1823_v10 = vpop.permute.xlu0 %1822 }
 0x884   : > { %3026 = vmatpush3.bf16.msra.mxu1 %v1823_v10 }
 0x885   : > { %3037 = vmatprep.subr.bf16.mxu1 %v3276_v18  ;;  %v3225_v15 = vpop.eup %3224 }
 0x886   : > { %v3227_v17 = vpop.eup %3226  ;;  %v1770_v19 = vmul.f32 %v3225_v15, %v3689_v49 }
 0x887   : > { %3028 = vmatmul.mubr.msk.bf16.vlgmr.msra.gmra.mxu1 %vm543_vm3, %v1772_v12  ;;  %v1769_v29 = vmul.f32 %v3227_v17, %v3685_v44  ;;  %v2058_v31 = vpop.permute.xlu0 %2057 }
 0x888   : > { %3039 = vmatprep.mubr.msk.bf16.mxu1 %vm3277_vm1, %v3276_v18  ;;  %v2063_v48 = vsel %vm345_vm2, %v2058_v31, 0 }
 0x889   : > { %v3229_v20 = vpop.eup %3228  ;;  %v1774_v34 = vpack.c.bf16 %v1770_v19, %v1769_v29 }
 0x88a   : > { %v1764_v42 = vmul.f32 %v3229_v20, %v3693_v0 }
 0x88b   : > { %v2109_v0 = vpop.permute.xlu0 %2108 }
 0x88c   : > { %v2114_v43 = vsel %vm345_vm2, %v2109_v0, 0 }
 0x88f   : > { %v2107_v61 = vpop.permute.xlu0 %2106 }
 0x8a8   : > { %v1733_v13 = vpop.xlane.xlu1 %1732 }
 0x8a9   : > { %3230 = vrcp.f32 %v1733_v13 }
 0x8ac   : > { %v1745_v14 = vpop.xlane.xlu1 %1744 }
 0x8ad   : > { %3232 = vrcp.f32 %v1745_v14 }
 0x8ae   : > { %3234 = vrcp.f32 %v1748_v7 }
 0x8b0   : > { %v1870_v16 = vpop.permute.xlu1 %1869 }
 0x8b4   : > { %v1917_v25 = vpop.permute.xlu1 %1916 }
 0x8b5   : > { %3038 = vmatpush3.bf16.msra.mxu1 %v1917_v25 }
 0x8b6   : > { %v3231_v32 = vpop.eup %3230  ;;  %3053 = vmatprep.subr.bf16.mxu1 %v3276_v18 }
 0x8b7   : > { %v1763_v37 = vmul.f32 %v3231_v32, %v3217_v47 }
 0x8b8   : > { %3040 = vmatmul.mubr.msk.bf16.vlgmr.msra.gmra.mxu1 %vm543_vm3, %v1774_v34  ;;  %v2056_v62 = vpop.permute.xlu1 %2055 }
 0x8b9   : > { %3054 = vmatpush3.bf16.xpose.msra.mxu1 %v2063_v48  ;;  %v1771_v49 = vpack.c.bf16 %v1764_v42, %v1763_v37  ;;  %3055 = vmatprep.mubr.msk.bf16.mxu1 %vm3277_vm1, %v3276_v18 }
 0x8ba   : > { %v3233_v44 = vpop.eup %3232  ;;  %3059 = vmatprep.subr.bf16.mxu1 %v3276_v18 }
 0x8bb   : > { %3022 = vmatmul.mubr.msk.bf16.vlgmr.msra.gmra.mxu0 %vm543_vm3, %v1771_v49  ;;  %v3235_v35 = vpop.eup %3234  ;;  %v1767_v41 = vmul.f32 %v3233_v44, %v3710_v58 }
 0x8bc   : > { %3032 = vmatpush3.bf16.msra.mxu0 %v1870_v16  ;;  %3033 = vmatprep.mubr.msk.bf16.mxu0 %vm3277_vm1, %v3276_v18  ;;  %v2160_v45 = vpop.permute.xlu1 %2159  ;;  %v1768_v51 = vmul.f32 %v3235_v35, %v3697_v40 }
 0x8bd   : > { %3117 = vmatprep.subr.msk.bf16.mxu0 %vm1330_vm4, %v3760_v1  ;;  %v2165_v25 = vsel %vm345_vm2, %v2160_v45, 0 }
 0x8be   : > { %v1773_v46 = vpack.c.bf16 %v1768_v51, %v1767_v41 }
 0x8c0   : > { %3056 = vmatmul.mubr.msk.bf16.vlgmr.msra.gmra.mxu1 %vm345_vm2, %v2056_v62  ;;  %v2211_v47 = vpop.permute.xlu1 %2210 }
 0x8c1   : > { %3060 = vmatpush3.bf16.xpose.msra.mxu1 %v2114_v43  ;;  %3061 = vmatprep.mubr.msk.bf16.mxu1 %vm3277_vm1, %v3276_v18  ;;  %v2216_v58 = vsel %vm345_vm2, %v2211_v47, 0 }
 0x8c2   : > { %3071 = vmatprep.subr.bf16.mxu1 %v3276_v18 }
 0x8c3   : > { %3034 = vmatmul.mubr.msk.bf16.vlgmr.msra.gmra.mxu0 %vm543_vm3, %v1773_v46  ;;  %v2158_v46 = vpop.permute.xlu0 %2157 }
 0x8c4   : > { %v2209_v40 = vpop.permute.xlu1 %2208  ;;  %3044 = vmatpush3.bf16.msra.mxu0 %v1980_v2 }
 0x8c5   : > { %3065 = vmatprep.subr.bf16.mxu0 %v3276_v18 }
 0x8c8   : > { %3062 = vmatmul.mubr.msk.bf16.vlgmr.msra.gmra.mxu1 %vm345_vm2, %v2107_v61 }
 0x8c9   : > { %3072 = vmatpush3.bf16.xpose.msra.mxu1 %v2216_v58  ;;  %3073 = vmatprep.mubr.msk.bf16.mxu1 %vm3277_vm1, %v3276_v18 }
 0x8ca   : > { %3083 = vmatprep.subr.bf16.mxu1 %v3276_v18 }
 0x8d0   : > { %3074 = vmatmul.mubr.msk.bf16.vlgmr.msra.gmra.mxu1 %vm345_vm2, %v2209_v40 }
 0x8d1   : > { %3085 = vmatprep.mubr.msk.bf16.mxu1 %vm3277_vm1, %v3276_v18 }
 0x947   : > { %v1862_v3 = vpop.f32.mrf.mxu1 }
 0x949   : > { %v3029_v4 = vpop.f32.mrf.mxu1 }
 0x94b   : > { %v1865_v5 = vpop.f32.mrf.mxu1 }
 0x94c   : > { %v1964_v16 = vpack.c.bf16 %v1865_v5, %v1862_v3  ;;  %v1449_v3 = vadd.f32 %v3628_v22, %v3652_v53 }
 0x94d   : > { %v3030_v6 = vpop.f32.mrf.mxu1 }
 0x978   : > { %v1956_v7 = vpop.f32.mrf.mxu1 }
 0x97a   : > { %v3041_v8 = vpop.f32.mrf.mxu1 }
 0x97b   : > { %v1815_v9 = vpop.f32.mrf.mxu0  ;;  %v1460_v8 = vadd.f32 %v3630_v23, %v3654_v54  ;;  %v1465_v23 = vadd.f32 %v3641_v27, %v3660_v57 }
 0x97c   : > { %v1959_v10 = vpop.f32.mrf.mxu1 }
 0x97d   : > { %v3023_v11 = vpop.f32.mrf.mxu0  ;;  %v1966_v49 = vpack.c.bf16 %v1959_v10, %v1956_v7 }
 0x97e   : > { %v3042_v12 = vpop.f32.mrf.mxu1 }
 0x97f   : > { %v1818_v13 = vpop.f32.mrf.mxu0 }
 0x980   : > { %v1963_v14 = vpack.c.bf16 %v1818_v13, %v1815_v9  ;;  %v2099_v15 = vpop.f32.mrf.mxu1 }
 0x981   : > { %v3024_v17 = vpop.f32.mrf.mxu0  ;;  %v2259_v19 = vsel %vm543_vm3, %v2099_v15, -inf }
 0x982   : > { %3045 = vmatprep.mubr.msk.bf16.mxu0 %vm345_vm2, %v1963_v14  ;;  %2260 = vmax.xlane.f32.xlu0 %v2259_v19  ;;  %v3057_v20 = vpop.f32.mrf.mxu1  ;;  %v1473_v14 = vadd.f32 %v3636_v26, %v3658_v56  ;;  %v1468_v56 = vadd.f32 %v3645_v30, %v3664_v60 }
 0x983   : > { %v1909_v29 = vpop.f32.mrf.mxu0  ;;  %3046 = vmatmul.mubr.msk.bf16.vlgmr.msra.gmra.mxu0 %vm345_vm2, %v1964_v16  ;;  %v1476_v20 = vadd.f32 %v3643_v28, %v3662_v59 }
 0x984   : > { %3066 = vmatpush3.bf16.xpose.msra.mxu0 %v2165_v25  ;;  %v2102_v31 = vpop.f32.mrf.mxu1 }
 0x985   : > { %v3035_v32 = vpop.f32.mrf.mxu0  ;;  %v2262_v34 = vsel %vm543_vm3, %v2102_v31, -inf  ;;  %3077 = vmatprep.subr.bf16.mxu0 %v3276_v18 }
 0x986   : > { %2263 = vmax.xlane.f32.xlu1 %v2262_v34  ;;  %v3058_v37 = vpop.f32.mrf.mxu1 }
 0x987   : > { %v1912_v42 = vpop.f32.mrf.mxu0 }
 0x988   : > { %v1965_v48 = vpack.c.bf16 %v1912_v42, %v1909_v29  ;;  %v2150_v62 = vpop.f32.mrf.mxu1 }
 0x989   : > { %v3036_v44 = vpop.f32.mrf.mxu0  ;;  %v2265_v35 = vsel %vm543_vm3, %v2150_v62, -inf }
 0x98a   : > { %3049 = vmatprep.mubr.msk.bf16.mxu0 %vm345_vm2, %v1965_v48  ;;  %2266 = vmax.xlane.f32.xlu0 %v2265_v35  ;;  %v3063_v0 = vpop.f32.mrf.mxu1 }
 0x98b   : > { %3050 = vmatmul.mubr.msk.bf16.gmra.mxu0 %vm345_vm2, %v1966_v49 }
 0x98c   : > { %v2153_v41 = vpop.f32.mrf.mxu1  ;;  %3067 = vmatprep.mubr.msk.bf16.mxu0 %vm3277_vm1, %v3276_v18 }
 0x98d   : > { %v2268_v45 = vsel %vm543_vm3, %v2153_v41, -inf }
 0x98e   : > { %2269 = vmax.xlane.f32.xlu0 %v2268_v45  ;;  %v3064_v51 = vpop.f32.mrf.mxu1 }
 0x990   : > { %v3779_v43 = vpop.f32.mrf.mxu1 }
 0x991   : > { %v2277_v37 = vsel %vm543_vm3, %v3779_v43, -inf }
 0x992   : > { %v3075_v47 = vpop.f32.mrf.mxu1 }
 0x993   : > { %3068 = vmatmul.mubr.msk.bf16.vlgmr.msra.gmra.mxu0 %vm345_vm2, %v2158_v46 }
 0x994   : > { %v3782_v61 = vpop.f32.mrf.mxu1  ;;  %3079 = vmatprep.mubr.msk.bf16.mxu0 %vm3277_vm1, %v3276_v18 }
 0x996   : > { %v3076_v58 = vpop.f32.mrf.mxu1 }
 0xa0b   : > { %v2261_v40 = vpop.xlane.xlu0 %2260 }
 0xa0c   : > { %v2283_v4 = vsub.f32 %v2099_v15, %v2261_v40 }
 0xa0e   : > { %v2291_v52 = vmul.f32 1.442695, %v2283_v4 }
 0xa0f   : > { %v2264_v5 = vpop.xlane.xlu1 %2263 }
 0xa10   : > { %v2284_v10 = vsub.f32 %v2102_v31, %v2264_v5  ;;  %3236 = vpow2.f32 %v2291_v52 }
 0xa12   : > { %v2293_v54 = vmul.f32 1.442695, %v2284_v10 }
 0xa13   : > { %v2267_v63 = vpop.xlane.xlu0 %2266 }
 0xa14   : > { %v2285_v12 = vsub.f32 %v2150_v62, %v2267_v63  ;;  %3238 = vpow2.f32 %v2293_v54  ;;  %v2280_v62 = vsel %vm543_vm3, %v3782_v61, -inf }
 0xa16   : > { %v2295_v17 = vmul.f32 1.442695, %v2285_v12 }
 0xa17   : > { %v2270_v22 = vpop.xlane.xlu0 %2269 }
 0xa18   : > { %v2286_v19 = vsub.f32 %v2153_v41, %v2270_v22  ;;  %3240 = vpow2.f32 %v2295_v17 }
 0xa1a   : > { %v2297_v27 = vmul.f32 1.442695, %v2286_v19 }
 0xa1c   : > { %3242 = vpow2.f32 %v2297_v27 }
 0xa1d   : > { %v3822_v30 = vpop.eup %3236 }
 0xa1e   : > { %v2307_v49 = vsel %vm543_vm3, %v3822_v30, 0.0 }
 0xa21   : > { %v3239_v48 = vpop.eup %3238 }
 0xa22   : > { %v2310_v35 = vsel %vm543_vm3, %v3239_v48, 0.0 }
 0xa25   : > { %v3828_v44 = vpop.eup %3240 }
 0xa26   : > { %v2313_v0 = vsel %vm543_vm3, %v3828_v44, 0.0 }
 0xa29   : > { %v3243_v41 = vpop.eup %3242 }
 0xa2a   : > { %v2316_v45 = vsel %vm543_vm3, %v3243_v41, 0.0 }
 0xa43   : > { %v3047_v2 = vpop.f32.mrf.mxu0 }
 0xa44   : > { %v3790_v6 = vadd.f32 %v3047_v2, %v1457_v50 }
 0xa45   : > { %v2016_v7 = vpop.f32.mrf.mxu0 }
 0xa46   : > { %v3794_v9 = vadd.f32 %v2016_v7, %v1449_v3 }
 0xa47   : > { %v3048_v11 = vpop.f32.mrf.mxu0 }
 0xa48   : > { %v3798_v13 = vadd.f32 %v3048_v11, %v1460_v8 }
 0xa49   : > { %v2019_v53 = vpop.f32.mrf.mxu0 }
 0xa4a   : > { %v3802_v15 = vadd.f32 %v2019_v53, %v1452_v21 }
 0xa4b   : > { %v3051_v16 = vpop.f32.mrf.mxu0 }
 0xa4c   : > { %v3806_v24 = vadd.f32 %v3051_v16, %v1473_v14 }
 0xa4d   : > { %v2032_v55 = vpop.f32.mrf.mxu0 }
 0xa4e   : > { %v3810_v25 = vadd.f32 %v2032_v55, %v1465_v23 }
 0xa4f   : > { %v3052_v26 = vpop.f32.mrf.mxu0 }
 0xa50   : > { %v3814_v57 = vadd.f32 %v3052_v26, %v1476_v20 }
 0xa51   : > { %v2035_v29 = vpop.f32.mrf.mxu0 }
 0xa52   : > { %v3816_v31 = vadd.f32 %v2035_v29, %v1468_v56 }
 0xa53   : > { %v2201_v32 = vpop.f32.mrf.mxu0 }
 0xa54   : > { %v2271_v34 = vsel %vm543_vm3, %v2201_v32, -inf }
 0xa55   : > { %2272 = vmax.xlane.f32.xlu1 %v2271_v34  ;;  %v3069_v28 = vpop.f32.mrf.mxu0 }
 0xa57   : > { %v2204_v59 = vpop.f32.mrf.mxu0 }
 0xa58   : > { %v2274_v42 = vsel %vm543_vm3, %v2204_v59, -inf }
 0xa59   : > { %2278 = vmax.xlane.f32.xlu1 %v2277_v37  ;;  %2275 = vmax.xlane.f32.xlu0 %v2274_v42  ;;  %v3070_v60 = vpop.f32.mrf.mxu0 }
 0xa5d   : > { %2281 = vmax.xlane.f32.xlu0 %v2280_v62  ;;  %2308 = vadd.xlane.f32.xlu1 %v2307_v49 }
 0xa61   : > { %2311 = vadd.xlane.f32.xlu0 %v2310_v35  ;;  %2314 = vadd.xlane.f32.xlu1 %v2313_v0  ;;  %v2544_v0 = vrot.slane %v3760_v1, 4 }
 0xa65   : > { %2317 = vadd.xlane.f32.xlu0 %v2316_v45 }
 0xade   : > { %v2273_v51 = vpop.xlane.xlu1 %2272 }
 0xae2   : > { %v2279_v46 = vpop.xlane.xlu1 %2278  ;;  %v2276_v47 = vpop.xlane.xlu0 %2275 }
 0xae3   : > { %v2289_v58 = vsub.f32 %v3779_v43, %v2279_v46  ;;  %v2288_v50 = vsub.f32 %v2204_v59, %v2276_v47 }
 0xae5   : > { %v2303_v40 = vmul.f32 1.442695, %v2289_v58  ;;  %v2301_v3 = vmul.f32 1.442695, %v2288_v50 }
 0xae6   : > { %v2282_v63 = vpop.xlane.xlu0 %2281  ;;  %v2309_v53 = vpop.xlane.xlu1 %2308 }
 0xae7   : > { %3244 = vpow2.f32 %v2303_v40  ;;  %v2290_v2 = vsub.f32 %v3782_v61, %v2282_v63  ;;  %v2287_v61 = vsub.f32 %v2201_v32, %v2273_v51 }
 0xae9   : > { %v2305_v4 = vmul.f32 1.442695, %v2290_v2  ;;  %v2299_v21 = vmul.f32 1.442695, %v2287_v61 }
 0xaea   : > { %v2312_v22 = vpop.xlane.xlu0 %2311  ;;  %v2315_v23 = vpop.xlane.xlu1 %2314 }
 0xaeb   : > { %3246 = vpow2.f32 %v2305_v4 }
 0xaec   : > { %3248 = vpow2.f32 %v2301_v3 }
 0xaed   : > { %3250 = vpow2.f32 %v2299_v21 }
 0xaee   : > { %3252 = vrcp.f32 %v2312_v22  ;;  %v2318_v14 = vpop.xlane.xlu0 %2317 }
 0xaef   : > { %3254 = vrcp.f32 %v2309_v53 }
 0xaf0   : > { %3256 = vrcp.f32 %v2318_v14 }
 0xaf1   : > { %3258 = vrcp.f32 %v2315_v23 }
 0xaf4   : > { %v3245_v5 = vpop.eup %3244 }
 0xaf5   : > { %v2325_v7 = vsel %vm543_vm3, %v3245_v5, 0.0 }
 0xaf6   : > { %2326 = vadd.xlane.f32.xlu1 %v2325_v7 }
 0xaf8   : > { %v3247_v8 = vpop.eup %3246 }
 0xaf9   : > { %v2328_v10 = vsel %vm543_vm3, %v3247_v8, 0.0  ;;  %v3838_v11 = vpop.eup %3248 }
 0xafa   : > { %2329 = vadd.xlane.f32.xlu0 %v2328_v10  ;;  %v2322_v43 = vsel %vm543_vm3, %v3838_v11, 0.0  ;;  %v3251_v52 = vpop.eup %3250 }
 0xafb   : > { %v2319_v12 = vsel %vm543_vm3, %v3251_v52, 0.0 }
 0xafe   : > { %2323 = vadd.xlane.f32.xlu0 %v2322_v43 }
 0xb07   : > { %2351 = vrot.lane.b32.xlu1 %v3360_v33, %s3288_s6  ;;  %v3253_v33 = vpop.eup %3252 }
 0xb08   : > { %v3255_v54 = vpop.eup %3254  ;;  %v2340_v16 = vmul.f32 %v3253_v33, %v3239_v48 }
 0xb09   : > { %v2339_v55 = vmul.f32 %v3255_v54, %v3822_v30 }
 0xb14   : > { %2398 = vrot.lane.b32.xlu0 %v3366_v38, %s3288_s6 }
 0xb2b   : > { %2320 = vadd.xlane.f32.xlu1 %v2319_v12  ;;  %v2774_v12 = vld [vmem:[%s3898_s4] ss:$0 sm:$0xff] }
 0xb3c   : > { %2445 = vrot.lane.b32.xlu1 %v3362_v36, %s3288_s6  ;;  %v2347_v36 = vpack.c.bf16 %v2340_v16, %v2339_v55 }
 0xb40   : > { %2492 = vrot.lane.b32.xlu1 %v3368_v39, %s3288_s6  ;;  %v3257_v39 = vpop.eup %3256 }
 0xb41   : > { %v3259_v26 = vpop.eup %3258  ;;  %v2342_v56 = vmul.f32 %v3257_v39, %v3243_v41  ;;  %v2558_v41 = vsel %vm1330_vm4, %v2544_v0, 0 }
 0xb42   : > { %v2341_v29 = vmul.f32 %v3259_v26, %v3828_v44 }
 0xb44   : > { %v2348_v32 = vpack.c.bf16 %v2342_v56, %v2341_v29 }
 0xb7f   : > { %v2327_v38 = vpop.xlane.xlu1 %2326 }
 0xb83   : > { %v2352_v17 = vpop.permute.xlu1 %2351  ;;  %v2330_v19 = vpop.xlane.xlu0 %2329 }
 0xb84   : > { %3078 = vmatpush3.bf16.msra.mxu0 %v2352_v17  ;;  %3260 = vrcp.f32 %v2330_v19 }
 0xb85   : > { %3089 = vmatprep.subr.bf16.mxu0 %v3276_v18  ;;  %3262 = vrcp.f32 %v2327_v38 }
 0xb87   : > { %3080 = vmatmul.mubr.msk.bf16.vlgmr.msra.gmra.mxu0 %vm543_vm3, %v2347_v36  ;;  %v2324_v20 = vpop.xlane.xlu0 %2323 }
 0xb88   : > { %3091 = vmatprep.mubr.msk.bf16.mxu0 %vm3277_vm1, %v3276_v18  ;;  %3264 = vrcp.f32 %v2324_v20 }
 0xb8b   : > { %v2399_v27 = vpop.permute.xlu0 %2398 }
 0xb8c   : > { %3084 = vmatpush3.bf16.msra.mxu1 %v2399_v27 }
 0xb8d   : > { %3095 = vmatprep.subr.bf16.mxu1 %v3276_v18 }
 0xb8f   : > { %3086 = vmatmul.mubr.msk.bf16.vlgmr.msra.gmra.mxu1 %vm543_vm3, %v2348_v32 }
 0xb90   : > { %3097 = vmatprep.mubr.msk.bf16.mxu1 %vm3277_vm1, %v3276_v18 }
 0xb91   : > { %v3261_v28 = vpop.eup %3260 }
 0xb92   : > { %v3263_v37 = vpop.eup %3262  ;;  %v2346_v42 = vmul.f32 %v3261_v28, %v3247_v8 }
 0xb93   : > { %v2345_v60 = vmul.f32 %v3263_v37, %v3245_v5 }
 0xb95   : > { %v2350_v48 = vpack.c.bf16 %v2346_v42, %v2345_v60  ;;  %v3265_v62 = vpop.eup %3264 }
 0xb96   : > { %v2344_v18 = vmul.f32 %v3265_v62, %v3838_v11 }
 0xbb4   : > { %v2321_v34 = vpop.xlane.xlu1 %2320 }
 0xbb5   : > { %3266 = vrcp.f32 %v2321_v34 }
 0xbb8   : > { %v2446_v59 = vpop.permute.xlu1 %2445 }
 0xbb9   : > { %3090 = vmatpush3.bf16.msra.mxu0 %v2446_v59 }
 0xbba   : > { %3118 = vmatprep.subr.msk.bf16.mxu0 %vm1330_vm4, %v2544_v0 }
 0xbbc   : > { %v2493_v30 = vpop.permute.xlu1 %2492 }
 0xbbd   : > { %3096 = vmatpush3.bf16.msra.mxu1 %v2493_v30 }
 0xbc0   : > { %3098 = vmatmul.mubr.msk.bf16.vlgmr.msra.gmra.mxu1 %vm543_vm3, %v2350_v48 }
 0xbc2   : > { %v3267_v49 = vpop.eup %3266 }
 0xbc3   : > { %v2343_v44 = vmul.f32 %v3267_v49, %v3251_v52 }
 0xbc5   : > { %v2349_v35 = vpack.c.bf16 %v2344_v18, %v2343_v44 }
 0xbc7   : > { %3092 = vmatmul.mubr.msk.bf16.vlgmr.msra.gmra.mxu0 %vm543_vm3, %v2349_v35 }
 0xbc8   : > { %3102 = vmatpush3.bf16.msra.mxu0 %v2558_v41 }
 0xc47   : > { %v2391_v45 = vpop.f32.mrf.mxu0 }
 0xc49   : > { %v3081_v51 = vpop.f32.mrf.mxu0 }
 0xc4b   : > { %v2394_v46 = vpop.f32.mrf.mxu0 }
 0xc4c   : > { %v2539_v47 = vpack.c.bf16 %v2394_v46, %v2391_v45 }
 0xc4d   : > { %v3082_v58 = vpop.f32.mrf.mxu0 }
 0xc4e   : > { %3103 = vmatprep.mubr.msk.bf16.mxu0 %vm345_vm2, %v2539_v47 }
 0xc4f   : > { %v2438_v40 = vpop.f32.mrf.mxu1 }
 0xc51   : > { %v3087_v50 = vpop.f32.mrf.mxu1 }
 0xc53   : > { %v2441_v63 = vpop.f32.mrf.mxu1 }
 0xc54   : > { %v2540_v2 = vpack.c.bf16 %v2441_v63, %v2438_v40 }
 0xc55   : > { %v3088_v3 = vpop.f32.mrf.mxu1 }
 0xc56   : > { %3104 = vmatmul.mubr.msk.bf16.vlgmr.msra.gmra.mxu0 %vm345_vm2, %v2540_v2 }
 0xc80   : > { %v2532_v1 = vpop.f32.mrf.mxu1 }
 0xc82   : > { %v3099_v4 = vpop.f32.mrf.mxu1 }
 0xc84   : > { %v2535_v5 = vpop.f32.mrf.mxu1 }
 0xc85   : > { %v2542_v61 = vpack.c.bf16 %v2535_v5, %v2532_v1 }
 0xc86   : > { %v3100_v7 = vpop.f32.mrf.mxu1 }
 0xc87   : > { %v2485_v8 = vpop.f32.mrf.mxu0 }
 0xc89   : > { %v3093_v10 = vpop.f32.mrf.mxu0 }
 0xc8b   : > { %v2488_v11 = vpop.f32.mrf.mxu0 }
 0xc8c   : > { %v2541_v43 = vpack.c.bf16 %v2488_v11, %v2485_v8 }
 0xc8d   : > { %v3094_v21 = vpop.f32.mrf.mxu0 }
 0xc8e   : > { %3107 = vmatprep.mubr.msk.bf16.mxu0 %vm345_vm2, %v2541_v43 }
 0xc8f   : > { %3108 = vmatmul.mubr.msk.bf16.gmra.mxu0 %vm345_vm2, %v2542_v61 }
 0xd16   : > { %v3105_v52 = vpop.f32.mrf.mxu0 }
 0xd17   : > { %v2627_v22 = vadd.f32 %v3105_v52, %v3790_v6 }
 0xd18   : > { %v2594_v53 = vpop.f32.mrf.mxu0 }
 0xd19   : > { %v2642_v14 = vadd.f32 %v2774_v12, %v2627_v22  ;;  %v2625_v23 = vadd.f32 %v2594_v53, %v3794_v9 }
 0xd1a   : > { %v3106_v33 = vpop.f32.mrf.mxu0 }
 0xd1b   : > { %2650 = vst.msk [vmem:[%s226_s11 + $0x10] sm:$0xff] %vm260_vm0, %v2642_v14  ;;  %v2640_v38 = vadd.f32 %v2774_v12, %v2625_v23  ;;  %v2628_v54 = vadd.f32 %v3106_v33, %v3798_v13 }
 0xd1c   : > { %v2597_v16 = vpop.f32.mrf.mxu0 }
 0xd1d   : > { %2648 = vst.msk [vmem:[%s226_s11] sm:$0xff] %vm260_vm0, %v2640_v38  ;;  %v2643_v17 = vadd.f32 %v2774_v12, %v2628_v54  ;;  %v2626_v6 = vadd.f32 %v2597_v16, %v3802_v15 }
 0xd1f   : > { %2651 = vst.msk [vmem:[%s226_s11 + $0x18] sm:$0xff] %vm260_vm0, %v2643_v17  ;;  %v2641_v19 = vadd.f32 %v2774_v12, %v2626_v6 }
 0xd21   : > { %2649 = vst.msk [vmem:[%s226_s11 + $0x8] sm:$0xff] %vm260_vm0, %v2641_v19 }
 0xd4f   : > { %v3109_v55 = vpop.f32.mrf.mxu0 }
 0xd50   : > { %v2631_v9 = vadd.f32 %v3109_v55, %v3806_v24 }
 0xd51   : > { %v2610_v36 = vpop.f32.mrf.mxu0 }
 0xd52   : > { %v2646_v39 = vadd.f32 %v2774_v12, %v2631_v9  ;;  %v2629_v20 = vadd.f32 %v2610_v36, %v3810_v25 }
 0xd53   : > { %v3110_v26 = vpop.f32.mrf.mxu0 }
 0xd54   : > { %2654 = vst.msk [vmem:[%s226_s11 + $0x30] sm:$0xff] %vm260_vm0, %v2646_v39  ;;  %v2644_v13 = vadd.f32 %v2774_v12, %v2629_v20  ;;  %v2632_v56 = vadd.f32 %v3110_v26, %v3814_v57 }
 0xd55   : > { %v2613_v27 = vpop.f32.mrf.mxu0 }
 0xd56   : > { %2652 = vst.msk [vmem:[%s226_s11 + $0x20] sm:$0xff] %vm260_vm0, %v2644_v13  ;;  %v2647_v15 = vadd.f32 %v2774_v12, %v2632_v56  ;;  %v2630_v29 = vadd.f32 %v2613_v27, %v3816_v31 }
 0xd58   : > { %2655 = vst.msk [vmem:[%s226_s11 + $0x38] sm:$0xff] %vm260_vm0, %v2647_v15  ;;  %v2645_v32 = vadd.f32 %v2774_v12, %v2630_v29 }
 0xd5a   : > { %2653 = vst.msk [vmem:[%s226_s11 + $0x28] sm:$0xff] %vm260_vm0, %v2645_v32 }
 0xd5b PF: > { %s15_s18 = sadd.s32 1, %s3274_s18  }
 0xd5c   : > { %p12_p4 = scmp.ge.s32.totalorder %s15_s18, 4  }
 0xd5e   :  { %14 = sbr.rel (!%p12_p4) target bundleno = 1 (0x1), region = 70 }

</bundles_post_ra>
